<compile_context>
chip_gen: v7x
topology: tpu7x:2x2x1
jax: 0.10.0
libtpu: 0.0.40
codegen_flags: <defaults>
</compile_context>

<pallas_src>
import math

import jax
import jax.numpy as jnp
from jax.experimental import pallas as pl
from jax.experimental.pallas import tpu as pltpu


def _padded_row_width(H, W):
    """Smallest padded row width >= W+2 such that H*Wp % 128 == 0 (fully
    lane-dense, unmasked output stores).  Falls back to W+2 if the round-up
    would more than double the per-row work."""
    base = W + 2
    step = 128 // math.gcd(H, 128)
    wp = ((base + step - 1) // step) * step
    return wp if wp <= 2 * base else base


def sift_forward(x_nchw, w1, b1, w2, b2):
    """x_nchw: (N, Cin, H, W).  w1: (3,3,Cin,Cout), w2: (Cin,Cout)."""
    N, Cin, H, W = x_nchw.shape
    Cout = w1.shape[-1]
    Wp = _padded_row_width(H, W)    # padded row width (24 for H=W=16)
    R = H * Wp                      # output frame size (lane-dense, mult of 128)
    S = (H + 2) * Wp                # flattened padded spatial size
    Sb = S + 2                      # +2 guard rows for the (kh=2, kw=2) tap

    # ---- layout glue (plain JAX): NCHW -> NHWC, zero-pad, flatten spatial ----
    x = jnp.transpose(x_nchw, (0, 2, 3, 1))                        # (N, H, W, Cin)
    x_pad = jnp.pad(x, ((0, 0), (1, 1), (1, Wp - W - 1), (0, 0)))  # (N, H+2, Wp, Cin)
    x_flat = x_pad.reshape(N, S, Cin)
    x_flat = jnp.pad(x_flat, ((0, 0), (0, 2), (0, 0)))             # (N, Sb, Cin)

    # ---- weight fold: seq2 (1x1) == center tap (kh=1, kw=1) of the 3x3 ------
    # w_ct[t] = w1[kh, kw].T  of shape (Cout, Cin),  t = kh*3 + kw
    w_ct = jnp.transpose(w1, (0, 1, 3, 2)).reshape(9, Cout, Cin)
    w_ct = w_ct.at[4].add(w2.T)
    b_col = (b1 + b2).reshape(Cout, 1).astype(jnp.float32)         # fused bias

    def kernel(x_ref, w_ref, b_ref, o_ref):
        # x_ref: (Sb, Cin)       flattened zero-padded image (channel-last)
        # w_ref: (9, Cout, Cin)  folded per-tap weights (VMEM-resident)
        # b_ref: (Cout, 1)       fused bias
        # o_ref: (Cout, R)       channel-major output frame (unmasked stores)
        acc = jnp.broadcast_to(b_ref[...], (Cout, R)).astype(jnp.float32)
        for kh in range(3):
            for kw in range(3):
                off = kh * Wp + kw                       # static shift
                x_tap = x_ref[pl.ds(off, R), :]          # (R, Cin) sublane slice
                w_tap = w_ref[kh * 3 + kw]               # (Cout, Cin)
                # contract over Cin on the MXU: (Cout,Cin) x (R,Cin) -> (Cout,R)
                acc = acc + jax.lax.dot_general(
                    w_tap, x_tap,
                    dimension_numbers=(((1,), (1,)), ((), ())),
                    preferred_element_type=jnp.float32)
        o_ref[...] = jnp.maximum(acc, 0.0).astype(o_ref.dtype)

    out_cmaj = pl.pallas_call(
        kernel,
        out_shape=jax.ShapeDtypeStruct((N, Cout, R), x_nchw.dtype),
        grid_spec=pltpu.PrefetchScalarGridSpec(
            num_scalar_prefetch=0,
            grid=(N,),
            in_specs=[
                pl.BlockSpec((None, Sb, Cin), lambda n: (n, 0, 0)),
                pl.BlockSpec((9, Cout, Cin), lambda n: (0, 0, 0)),
                pl.BlockSpec((Cout, 1), lambda n: (0, 0)),
            ],
            out_specs=pl.BlockSpec((None, Cout, R), lambda n: (n, 0, 0)),
        ),
        compiler_params=pltpu.CompilerParams(
            dimension_semantics=("parallel",)),
    )(x_flat, w_ct, b_col)

    # (N, Cout, H*Wp) -> (N, Cout, H, Wp) -> drop the junk columns.
    # Pure metadata reshape + slice: no output transpose / extra HBM round trip.
    return out_cmaj.reshape(N, Cout, H, Wp)[:, :, :, :W]


def reference_forward(x_nchw, w1, b1, w2, b2):
    """Pure-JAX reference using lax convolutions (NCHW)."""
    w1_oihw = jnp.transpose(w1, (3, 2, 0, 1))
    w2_oihw = w2.T[:, :, None, None]
    y1 = jax.lax.conv_general_dilated(
        x_nchw, w1_oihw, window_strides=(1, 1), padding="SAME",
        dimension_numbers=("NCHW", "OIHW", "NCHW"),
        precision=jax.lax.Precision.HIGHEST) + b1[None, :, None, None]
    y2 = jax.lax.conv_general_dilated(
        x_nchw, w2_oihw, window_strides=(1, 1), padding="SAME",
        dimension_numbers=("NCHW", "OIHW", "NCHW"),
        precision=jax.lax.Precision.HIGHEST) + b2[None, :, None, None]
    return jnp.maximum(y1 + y2, 0.0)


if __name__ == "__main__":
    key = jax.random.PRNGKey(0)
    k_x, k_w1, k_b1, k_w2, k_b2 = jax.random.split(key, 5)

    N, Cin, H, W = 2, 4, 16, 16
    Cout = 8  # diff_chan=True -> seq2 is a 1x1 projection conv

    x = jax.random.normal(k_x, (N, Cin, H, W), dtype=jnp.float32)

    # deterministic parameter init (Kaiming-like scaling)
    w1 = jax.random.normal(k_w1, (3, 3, Cin, Cout), jnp.float32) * (
        1.0 / jnp.sqrt(9.0 * Cin))
    b1 = jax.random.normal(k_b1, (Cout,), jnp.float32) * 0.01
    w2 = jax.random.normal(k_w2, (Cin, Cout), jnp.float32) * (
        1.0 / jnp.sqrt(float(Cin)))
    b2 = jax.random.normal(k_b2, (Cout,), jnp.float32) * 0.01

    out = sift_forward(x, w1, b1, w2, b2)
    out = jax.block_until_ready(out)

    ref = reference_forward(x, w1, b1, w2, b2)
    assert out.shape == (N, Cout, H, W)
    assert jnp.allclose(out, ref, atol=1e-4, rtol=1e-4), "mismatch vs reference"

    print("KERNEL_OK")
</pallas_src>

<mosaic_0001>
module attributes {stable_mosaic.version = 11 : i64} {
  func.func @kernel(%arg0: i32, %arg1: memref<1x434x4xf32, #tpu.memory_space<vmem>>, %arg2: memref<9x8x4xf32, #tpu.memory_space<vmem>>, %arg3: memref<8x1xf32, #tpu.memory_space<vmem>>, %arg4: memref<1x8x384xf32, #tpu.memory_space<vmem>>) attributes {dimension_semantics = [#tpu.dimension_semantics<parallel>], iteration_bounds = array<i64: 2>, scalar_prefetch = 0 : i64, scratch_operands = 0 : i64, tpu.core_type = #tpu.core_type<tc>, window_params = [{transform_indices = @transform_0, window_bounds = array<i64: 1, 434, 4>}, {pipeline_mode = #tpu.pipeline_mode<synchronous>, transform_indices = @transform_1, window_bounds = array<i64: 9, 8, 4>}, {pipeline_mode = #tpu.pipeline_mode<synchronous>, transform_indices = @transform_2, window_bounds = array<i64: 8, 1>}, {transform_indices = @transform_3, window_bounds = array<i64: 1, 8, 384>}]} {
    %c0 = arith.constant 0 : index
    %c0_0 = arith.constant 0 : index
    %0 = vector.load %arg3[%c0, %c0_0] : memref<8x1xf32, #tpu.memory_space<vmem>>, vector<8x1xf32>
    %1 = vector.shape_cast %0 : vector<8x1xf32> to vector<8x1xf32>
    %2 = vector.broadcast %1 : vector<8x1xf32> to vector<8x384xf32>
    %c0_1 = arith.constant 0 : index
    %c0_2 = arith.constant 0 : index
    %c0_3 = arith.constant 0 : index
    %3 = vector.load %arg1[%c0_1, %c0_2, %c0_3] : memref<1x434x4xf32, #tpu.memory_space<vmem>>, vector<1x384x4xf32>
    %4 = vector.shape_cast %3 : vector<1x384x4xf32> to vector<384x4xf32>
    %c0_4 = arith.constant 0 : index
    %c0_5 = arith.constant 0 : index
    %c0_6 = arith.constant 0 : index
    %5 = vector.load %arg2[%c0_4, %c0_5, %c0_6] : memref<9x8x4xf32, #tpu.memory_space<vmem>>, vector<1x8x4xf32>
    %6 = vector.shape_cast %5 : vector<1x8x4xf32> to vector<8x4xf32>
    %cst = arith.constant dense<0.000000e+00> : vector<8x384xf32>
    %7 = tpu.matmul %6, %4, %cst {dimension_numbers = #tpu.dot_dimension_numbers<[1], [1], [0], [0], [0, 0, 1, 0], [], []>} : vector<8x4xf32>, vector<384x4xf32>, vector<8x384xf32> -> vector<8x384xf32>
    %8 = arith.addf %2, %7 : vector<8x384xf32>
    %c0_7 = arith.constant 0 : index
    %c1 = arith.constant 1 : index
    %c0_8 = arith.constant 0 : index
    %9 = vector.load %arg1[%c0_7, %c1, %c0_8] : memref<1x434x4xf32, #tpu.memory_space<vmem>>, vector<1x384x4xf32>
    %10 = vector.shape_cast %9 : vector<1x384x4xf32> to vector<384x4xf32>
    %c1_9 = arith.constant 1 : index
    %c0_10 = arith.constant 0 : index
    %c0_11 = arith.constant 0 : index
    %11 = vector.load %arg2[%c1_9, %c0_10, %c0_11] : memref<9x8x4xf32, #tpu.memory_space<vmem>>, vector<1x8x4xf32>
    %12 = vector.shape_cast %11 : vector<1x8x4xf32> to vector<8x4xf32>
    %cst_12 = arith.constant dense<0.000000e+00> : vector<8x384xf32>
    %13 = tpu.matmul %12, %10, %cst_12 {dimension_numbers = #tpu.dot_dimension_numbers<[1], [1], [0], [0], [0, 0, 1, 0], [], []>} : vector<8x4xf32>, vector<384x4xf32>, vector<8x384xf32> -> vector<8x384xf32>
    %14 = arith.addf %8, %13 : vector<8x384xf32>
    %c0_13 = arith.constant 0 : index
    %c2 = arith.constant 2 : index
    %c0_14 = arith.constant 0 : index
    %15 = vector.load %arg1[%c0_13, %c2, %c0_14] : memref<1x434x4xf32, #tpu.memory_space<vmem>>, vector<1x384x4xf32>
    %16 = vector.shape_cast %15 : vector<1x384x4xf32> to vector<384x4xf32>
    %c2_15 = arith.constant 2 : index
    %c0_16 = arith.constant 0 : index
    %c0_17 = arith.constant 0 : index
    %17 = vector.load %arg2[%c2_15, %c0_16, %c0_17] : memref<9x8x4xf32, #tpu.memory_space<vmem>>, vector<1x8x4xf32>
    %18 = vector.shape_cast %17 : vector<1x8x4xf32> to vector<8x4xf32>
    %cst_18 = arith.constant dense<0.000000e+00> : vector<8x384xf32>
    %19 = tpu.matmul %18, %16, %cst_18 {dimension_numbers = #tpu.dot_dimension_numbers<[1], [1], [0], [0], [0, 0, 1, 0], [], []>} : vector<8x4xf32>, vector<384x4xf32>, vector<8x384xf32> -> vector<8x384xf32>
    %20 = arith.addf %14, %19 : vector<8x384xf32>
    %c0_19 = arith.constant 0 : index
    %c24 = arith.constant 24 : index
    %c0_20 = arith.constant 0 : index
    %21 = vector.load %arg1[%c0_19, %c24, %c0_20] : memref<1x434x4xf32, #tpu.memory_space<vmem>>, vector<1x384x4xf32>
    %22 = vector.shape_cast %21 : vector<1x384x4xf32> to vector<384x4xf32>
    %c3 = arith.constant 3 : index
    %c0_21 = arith.constant 0 : index
    %c0_22 = arith.constant 0 : index
    %23 = vector.load %arg2[%c3, %c0_21, %c0_22] : memref<9x8x4xf32, #tpu.memory_space<vmem>>, vector<1x8x4xf32>
    %24 = vector.shape_cast %23 : vector<1x8x4xf32> to vector<8x4xf32>
    %cst_23 = arith.constant dense<0.000000e+00> : vector<8x384xf32>
    %25 = tpu.matmul %24, %22, %cst_23 {dimension_numbers = #tpu.dot_dimension_numbers<[1], [1], [0], [0], [0, 0, 1, 0], [], []>} : vector<8x4xf32>, vector<384x4xf32>, vector<8x384xf32> -> vector<8x384xf32>
    %26 = arith.addf %20, %25 : vector<8x384xf32>
    %c0_24 = arith.constant 0 : index
    %c25 = arith.constant 25 : index
    %c0_25 = arith.constant 0 : index
    %27 = vector.load %arg1[%c0_24, %c25, %c0_25] : memref<1x434x4xf32, #tpu.memory_space<vmem>>, vector<1x384x4xf32>
    %28 = vector.shape_cast %27 : vector<1x384x4xf32> to vector<384x4xf32>
    %c4 = arith.constant 4 : index
    %c0_26 = arith.constant 0 : index
    %c0_27 = arith.constant 0 : index
    %29 = vector.load %arg2[%c4, %c0_26, %c0_27] : memref<9x8x4xf32, #tpu.memory_space<vmem>>, vector<1x8x4xf32>
    %30 = vector.shape_cast %29 : vector<1x8x4xf32> to vector<8x4xf32>
    %cst_28 = arith.constant dense<0.000000e+00> : vector<8x384xf32>
    %31 = tpu.matmul %30, %28, %cst_28 {dimension_numbers = #tpu.dot_dimension_numbers<[1], [1], [0], [0], [0, 0, 1, 0], [], []>} : vector<8x4xf32>, vector<384x4xf32>, vector<8x384xf32> -> vector<8x384xf32>
    %32 = arith.addf %26, %31 : vector<8x384xf32>
    %c0_29 = arith.constant 0 : index
    %c26 = arith.constant 26 : index
    %c0_30 = arith.constant 0 : index
    %33 = vector.load %arg1[%c0_29, %c26, %c0_30] : memref<1x434x4xf32, #tpu.memory_space<vmem>>, vector<1x384x4xf32>
    %34 = vector.shape_cast %33 : vector<1x384x4xf32> to vector<384x4xf32>
    %c5 = arith.constant 5 : index
    %c0_31 = arith.constant 0 : index
    %c0_32 = arith.constant 0 : index
    %35 = vector.load %arg2[%c5, %c0_31, %c0_32] : memref<9x8x4xf32, #tpu.memory_space<vmem>>, vector<1x8x4xf32>
    %36 = vector.shape_cast %35 : vector<1x8x4xf32> to vector<8x4xf32>
    %cst_33 = arith.constant dense<0.000000e+00> : vector<8x384xf32>
    %37 = tpu.matmul %36, %34, %cst_33 {dimension_numbers = #tpu.dot_dimension_numbers<[1], [1], [0], [0], [0, 0, 1, 0], [], []>} : vector<8x4xf32>, vector<384x4xf32>, vector<8x384xf32> -> vector<8x384xf32>
    %38 = arith.addf %32, %37 : vector<8x384xf32>
    %c0_34 = arith.constant 0 : index
    %c48 = arith.constant 48 : index
    %c0_35 = arith.constant 0 : index
    %39 = vector.load %arg1[%c0_34, %c48, %c0_35] : memref<1x434x4xf32, #tpu.memory_space<vmem>>, vector<1x384x4xf32>
    %40 = vector.shape_cast %39 : vector<1x384x4xf32> to vector<384x4xf32>
    %c6 = arith.constant 6 : index
    %c0_36 = arith.constant 0 : index
    %c0_37 = arith.constant 0 : index
    %41 = vector.load %arg2[%c6, %c0_36, %c0_37] : memref<9x8x4xf32, #tpu.memory_space<vmem>>, vector<1x8x4xf32>
    %42 = vector.shape_cast %41 : vector<1x8x4xf32> to vector<8x4xf32>
    %cst_38 = arith.constant dense<0.000000e+00> : vector<8x384xf32>
    %43 = tpu.matmul %42, %40, %cst_38 {dimension_numbers = #tpu.dot_dimension_numbers<[1], [1], [0], [0], [0, 0, 1, 0], [], []>} : vector<8x4xf32>, vector<384x4xf32>, vector<8x384xf32> -> vector<8x384xf32>
    %44 = arith.addf %38, %43 : vector<8x384xf32>
    %c0_39 = arith.constant 0 : index
    %c49 = arith.constant 49 : index
    %c0_40 = arith.constant 0 : index
    %45 = vector.load %arg1[%c0_39, %c49, %c0_40] : memref<1x434x4xf32, #tpu.memory_space<vmem>>, vector<1x384x4xf32>
    %46 = vector.shape_cast %45 : vector<1x384x4xf32> to vector<384x4xf32>
    %c7 = arith.constant 7 : index
    %c0_41 = arith.constant 0 : index
    %c0_42 = arith.constant 0 : index
    %47 = vector.load %arg2[%c7, %c0_41, %c0_42] : memref<9x8x4xf32, #tpu.memory_space<vmem>>, vector<1x8x4xf32>
    %48 = vector.shape_cast %47 : vector<1x8x4xf32> to vector<8x4xf32>
    %cst_43 = arith.constant dense<0.000000e+00> : vector<8x384xf32>
    %49 = tpu.matmul %48, %46, %cst_43 {dimension_numbers = #tpu.dot_dimension_numbers<[1], [1], [0], [0], [0, 0, 1, 0], [], []>} : vector<8x4xf32>, vector<384x4xf32>, vector<8x384xf32> -> vector<8x384xf32>
    %50 = arith.addf %44, %49 : vector<8x384xf32>
    %c0_44 = arith.constant 0 : index
    %c50 = arith.constant 50 : index
    %c0_45 = arith.constant 0 : index
    %51 = vector.load %arg1[%c0_44, %c50, %c0_45] : memref<1x434x4xf32, #tpu.memory_space<vmem>>, vector<1x384x4xf32>
    %52 = vector.shape_cast %51 : vector<1x384x4xf32> to vector<384x4xf32>
    %c8 = arith.constant 8 : index
    %c0_46 = arith.constant 0 : index
    %c0_47 = arith.constant 0 : index
    %53 = vector.load %arg2[%c8, %c0_46, %c0_47] : memref<9x8x4xf32, #tpu.memory_space<vmem>>, vector<1x8x4xf32>
    %54 = vector.shape_cast %53 : vector<1x8x4xf32> to vector<8x4xf32>
    %cst_48 = arith.constant dense<0.000000e+00> : vector<8x384xf32>
    %55 = tpu.matmul %54, %52, %cst_48 {dimension_numbers = #tpu.dot_dimension_numbers<[1], [1], [0], [0], [0, 0, 1, 0], [], []>} : vector<8x4xf32>, vector<384x4xf32>, vector<8x384xf32> -> vector<8x384xf32>
    %56 = arith.addf %50, %55 : vector<8x384xf32>
    %cst_49 = arith.constant 0.000000e+00 : f32
    %57 = vector.broadcast %cst_49 : f32 to vector<8x384xf32>
    %58 = arith.maximumf %56, %57 : vector<8x384xf32>
    %c0_50 = arith.constant 0 : index
    %c0_51 = arith.constant 0 : index
    %c0_52 = arith.constant 0 : index
    %59 = vector.load %arg4[%c0_50, %c0_51, %c0_52] : memref<1x8x384xf32, #tpu.memory_space<vmem>>, vector<1x8x384xf32>
    %60 = vector.shape_cast %59 : vector<1x8x384xf32> to vector<8x384xf32>
    %61 = vector.shape_cast %58 : vector<8x384xf32> to vector<1x8x384xf32>
    tpu.vector_store %arg4[%c0_50, %c0_51, %c0_52], %61 {strides = array<i32>} : memref<1x8x384xf32, #tpu.memory_space<vmem>>, vector<1x8x384xf32>,
    return
  }
  func.func @transform_0(%arg0: i32) -> (i32, i32, i32) {
    %c0_i32 = arith.constant 0 : i32
    %c0_i32_0 = arith.constant 0 : i32
    %c0_i32_1 = arith.constant 0 : i32
    return %arg0, %c0_i32, %c0_i32_0 : i32, i32, i32
  }
  func.func @transform_1(%arg0: i32) -> (i32, i32, i32) {
    %c0_i32 = arith.constant 0 : i32
    %c0_i32_0 = arith.constant 0 : i32
    %c0_i32_1 = arith.constant 0 : i32
    %c0_i32_2 = arith.constant 0 : i32
    return %c0_i32, %c0_i32_0, %c0_i32_1 : i32, i32, i32
  }
  func.func @transform_2(%arg0: i32) -> (i32, i32) {
    %c0_i32 = arith.constant 0 : i32
    %c0_i32_0 = arith.constant 0 : i32
    %c0_i32_1 = arith.constant 0 : i32
    return %c0_i32, %c0_i32_0 : i32, i32
  }
  func.func @transform_3(%arg0: i32) -> (i32, i32, i32) {
    %c0_i32 = arith.constant 0 : i32
    %c0_i32_0 = arith.constant 0 : i32
    %c0_i32_1 = arith.constant 0 : i32
    return %arg0, %c0_i32, %c0_i32_0 : i32, i32, i32
  }
}

</mosaic_0001>

<bundles_post_ra>
// kernel: tpu_custom_call.1
= control target key start
LH: loop header
LB: loop body
LE: loop exit
PB: predicated region body
PF: predicated region fallthrough
CT: control target
= control target key end

     0   :  { %8 = vsyncpa [#allocation3], 0  ;;  %s7061_s0 = inlined_call_operand.vmem [shape: f32[2,434,4], index: 0, kind: input, shape index: {}]   ;;  %s7062_s1 = inlined_call_operand.vmem [shape: f32[9,8,4], index: 1, kind: input, shape index: {}]   ;;  %s7063_s2 = inlined_call_operand.vmem [shape: f32[8,1], index: 2, kind: input, shape index: {}]   ;;  %s7064_s3 = inlined_call_operand.hbm [shape: f32[2,8,384], index: 3, kind: output, shape index: {}]  }
   0x1   :  { %10 = vsyncpa [#allocation3 + $0x1], 0  ;;  %s5455_s12 = smov 0   ;;  %s5457_s13 = smov 0  }
   0x2   :  { %s5459_s14 = smov 0   ;;  %s5461_s15 = smov 0  }
   0x3 LB: > { %s5476_s16 = sadd.s32 4294967295, %s5428_s15   ;;  %s3324_s17 = sadd.s32 4294967294, %s5428_s15   ;;  %s5428_s15 = sphi %s5461_s15, %s7320_s15   ;;  %s5424_s14 = sphi %s5459_s14, %s7319_s14   ;;  %s5420_s13 = sphi %s5457_s13, %s7318_s13   ;;  %s5416_s12 = sphi %s5455_s12, %s7317_s12  }
   0x4   : > { %s5480_s18 = sadd.s32 1, %s5428_s15   ;;  %s91_s19 = sadd.s32 1, %s5424_s14 }
   0x5   : > { %s88_s20 = ssub.s32 %s5428_s15, %s5480_s18  ;;  %p101_p0 = scmp.ne.s32.totalorder %s5424_s14, %s5420_s13 }
   0x6   : > { %p89_p1 = scmp.eq.s32.totalorder %s88_s20, 0  ;;  %p102_p2 = scmp.eq.s32.totalorder %s5476_s16, 1 }
   0x7   : > { %p107_p3 = scmp.ne.s32.totalorder %s5420_s13, %s5416_s12  ;;  %p108_p4 = scmp.eq.s32.totalorder %s3324_s17, 1 }
   0x8   : > { %s5491_s21 = scalar_select %p89_p1, %s5424_s14, %s91_s19  }
   0x9   : > { %p5493_p5 = por %p102_p2, %p101_p0  ;;  %p5497_p6 = por %p108_p4, %p107_p3 }
   0xa   : > { %p3327_p7 = scmp.ge.s32.totalorder %s5428_s15, 1  ;;  %p140_p8 = scmp.lt.s32.totalorder %s5428_s15, 3 }
   0xc   : > { %p141_p9 = pnand %p3327_p7, %p140_p8 }
   0xe   : > { %144 = sbr.rel (%p141_p9) target bundleno = 839 (0x347), region = 32 }
  0x15   : > { %p164_p10 = scmp.lt.s32.totalorder %s5476_s16, 1  ;;  %v5507_v0 = vld [vmem:[%s7062_s1] sm:$0xff]  ;;  %v7065_v1 = vmov 0.0|0.0   ;;  %vm224_vm0 = vcmask 31744   ;;  %vm5431_vm1 = vmmov 0   ;;  %v7067_v2 = vmov 0.0  }
  0x16   : > { %4612 = vmatprep.subr.bf16.mxu1 %v7065_v1  ;;  %4281 = vmatprep.mubr.msk.f32.mxu1 %vm5431_vm1, %v7067_v2  ;;  %vm5522_vm2 = vmpackc.low %vm224_vm0, %vm224_vm0  ;;  %s161_s5 = sand.u32 1, %s5420_s13   ;;  %s5434_s19 = smov [#allocation2]  }
  0x17   : > { %s165_s26 = scalar_select %p164_p10, %s5476_s16, 1  ;;  %3822 = vmatprep.mubr.msk.f32.mxu0 %vm224_vm0, %v5507_v0 }
  0x18   : > { %s5319_s6 = smul.u32 24, %s161_s5  ;;  %s5370_s20 = sshll.u32 %s5434_s19, 4  ;;  %s5371_s20 = int_to_ptr.vmem [resolvable:$false] %s5370_s20 }
  0x19   : > { %s5320_s27 = smul.u32 440, %s165_s26  ;;  %s5372_s24 = scalar_lea.vmem %s5371_s20, 768 }
  0x1a   : > { %s163_s7 = scalar_lea.vmem [#allocation2], %s5319_s6 }
  0x1b   : > { %s5518_s30 = scalar_lea.vmem %s7061_s0, %s5320_s27  ;;  %s3265_s8 = sshll.u32 %s163_s7, 4  ;;  %s7021_s8 = int_to_ptr.vmem [resolvable:$true] %s3265_s8 }
  0x1c   : > { %v5527_v4 = vld [vmem:[%s5518_s30 + $0x80] sm:$0xff]  ;;  %v5530_v5 = vld [vmem:[%s5518_s30 + $0x88] sm:$0xff]  ;;  %v5545_v13 = vld [vmem:[%s5518_s30 + $0x90] sm:$0xff]  ;;  %s5366_s17 = scalar_lea.vmem %s7021_s8, 384  ;;  %p5373_p0 = scmp.lt.s32.totalorder %s7021_s8, %s5371_s20 }
  0x1d   : > { %v5533_v6 = vld [vmem:[%s5518_s30 + $0x100] sm:$0xff]  ;;  %v4564_v7 = vpack.c.bf16 %v5530_v5, %v5527_v4  ;;  %v5538_v8 = vld [vmem:[%s5518_s30 + $0x108] sm:$0xff]  ;;  %v5548_v14 = vld [vmem:[%s5518_s30 + $0x98] sm:$0xff]  ;;  %p5367_p11 = scmp.ne.s32.totalorder %s7021_s8, %s5366_s17  ;;  %p5374_p1 = scmp.lt.s32.totalorder %s5372_s24, %s5366_s17 }
  0x1e   : > { %v175_v9 = vld [vmem:[%s5518_s30] sm:$0xff]  ;;  %v176_v10 = vld [vmem:[%s5518_s30 + $0x8] sm:$0xff]  ;;  %v4613_v11 = vpack.c.bf16 %v5538_v8, %v5533_v6  ;;  %v4570_v15 = vpack.c.bf16 %v5548_v14, %v5545_v13  ;;  %v5559_v16 = vld [vmem:[%s5518_s30 + $0x110] sm:$0xff] }
  0x1f   : > { %v4567_v12 = vpack.c.bf16 %v176_v10, %v175_v9  ;;  %4566 = vmatprep.subr.msk.bf16.mxu0 %vm5522_vm2, %v4564_v7  ;;  %v5565_v17 = vld [vmem:[%s5518_s30 + $0x118] sm:$0xff]  ;;  %v177_v18 = vld [vmem:[%s5518_s30 + $0x10] sm:$0xff]  ;;  %v5572_v20 = vld [vmem:[%s5518_s30 + $0xa0] sm:$0xff]  ;;  %p5368_p12 = pnand %p5367_p11, %p5493_p5  ;;  %p5375_p2 = por %p5374_p1, %p5373_p0 }
  0x20   : > { %4615 = vmatpush3.bf16.xpose.msk.msra.mxu1 %vm5522_vm2, %v4613_v11  ;;  %v5569_v19 = vld [vmem:[%s5518_s30 + $0x18] sm:$0xff]  ;;  %v5575_v21 = vld [vmem:[%s5518_s30 + $0xa8] sm:$0xff]  ;;  %v4617_v22 = vpack.c.bf16 %v5565_v17, %v5559_v16  ;;  %v5587_v25 = vld [vmem:[%s5518_s30 + $0x120] sm:$0xff] }
  0x21   : > { %4569 = vmatpush3.bf16.xpose.msk.msra.mxu0 %vm5522_vm2, %v4567_v12  ;;  %4616 = vmatprep.subr.bf16.mxu1 %v7065_v1  ;;  %v4573_v23 = vpack.c.bf16 %v5569_v19, %v177_v18  ;;  %v4576_v24 = vpack.c.bf16 %v5575_v21, %v5572_v20  ;;  %v5593_v26 = vld [vmem:[%s5518_s30 + $0x128] sm:$0xff]  ;;  %v5596_v27 = vld [vmem:[%s5518_s30 + $0x20] sm:$0xff]  ;;  %v5602_v29 = vld [vmem:[%s5518_s30 + $0xb0] sm:$0xff]  ;;  %p5369_p13 = pneg %p5368_p12 }
  0x22   : > { %4572 = vmatprep.subr.msk.bf16.mxu0 %vm5522_vm2, %v4570_v15  ;;  %v5599_v28 = vld [vmem:[%s5518_s30 + $0x28] sm:$0xff]  ;;  %v5605_v30 = vld [vmem:[%s5518_s30 + $0xb8] sm:$0xff]  ;;  %v4621_v31 = vpack.c.bf16 %v5593_v26, %v5587_v25  ;;  %v5618_v34 = vld [vmem:[%s5518_s30 + $0x130] sm:$0xff] }
  0x23   : > { %v4579_v32 = vpack.c.bf16 %v5599_v28, %v5596_v27  ;;  %v4582_v33 = vpack.c.bf16 %v5605_v30, %v5602_v29  ;;  %v5624_v35 = vld [vmem:[%s5518_s30 + $0x138] sm:$0xff]  ;;  %v5627_v36 = vld [vmem:[%s5518_s30 + $0x30] sm:$0xff]  ;;  %v5633_v38 = vld [vmem:[%s5518_s30 + $0xc0] sm:$0xff]  ;;  %p5376_p3 = pnand %p5375_p2, %p5369_p13 }
  0x24   : > { %v5630_v37 = vld [vmem:[%s5518_s30 + $0x38] sm:$0xff]  ;;  %v5636_v39 = vld [vmem:[%s5518_s30 + $0xc8] sm:$0xff]  ;;  %v4625_v40 = vpack.c.bf16 %v5624_v35, %v5618_v34  ;;  %v5649_v43 = vld [vmem:[%s5518_s30 + $0x140] sm:$0xff] }
  0x25   : > { %v4585_v41 = vpack.c.bf16 %v5630_v37, %v5627_v36  ;;  %v4588_v42 = vpack.c.bf16 %v5636_v39, %v5633_v38  ;;  %v5655_v44 = vld [vmem:[%s5518_s30 + $0x148] sm:$0xff]  ;;  %v5658_v45 = vld [vmem:[%s5518_s30 + $0x40] sm:$0xff]  ;;  %v5664_v47 = vld [vmem:[%s5518_s30 + $0xd0] sm:$0xff] }
  0x26   : > { %v5661_v46 = vld [vmem:[%s5518_s30 + $0x48] sm:$0xff]  ;;  %v5667_v48 = vld [vmem:[%s5518_s30 + $0xd8] sm:$0xff]  ;;  %v4629_v49 = vpack.c.bf16 %v5655_v44, %v5649_v43  ;;  %v5680_v52 = vld [vmem:[%s5518_s30 + $0x150] sm:$0xff] }
  0x27   : > { %v4591_v50 = vpack.c.bf16 %v5661_v46, %v5658_v45  ;;  %v4594_v51 = vpack.c.bf16 %v5667_v48, %v5664_v47  ;;  %v5686_v53 = vld [vmem:[%s5518_s30 + $0x158] sm:$0xff]  ;;  %v5689_v54 = vld [vmem:[%s5518_s30 + $0x50] sm:$0xff]  ;;  %v5695_v56 = vld [vmem:[%s5518_s30 + $0xe0] sm:$0xff] }
  0x28   : > { %4619 = vmatpush3.bf16.xpose.msk.msra.mxu1 %vm5522_vm2, %v4617_v22  ;;  %v5692_v55 = vld [vmem:[%s5518_s30 + $0x58] sm:$0xff]  ;;  %v5698_v57 = vld [vmem:[%s5518_s30 + $0xe8] sm:$0xff]  ;;  %v4633_v58 = vpack.c.bf16 %v5686_v53, %v5680_v52  ;;  %v5711_v61 = vld [vmem:[%s5518_s30 + $0x160] sm:$0xff] }
  0x29   : > { %4575 = vmatpush3.bf16.xpose.msk.msra.mxu0 %vm5522_vm2, %v4573_v23  ;;  %4620 = vmatprep.subr.bf16.mxu1 %v7065_v1  ;;  %v4597_v59 = vpack.c.bf16 %v5692_v55, %v5689_v54  ;;  %v4600_v60 = vpack.c.bf16 %v5698_v57, %v5695_v56  ;;  %v5717_v62 = vld [vmem:[%s5518_s30 + $0x168] sm:$0xff]  ;;  %v5720_v63 = vld [vmem:[%s5518_s30 + $0x60] sm:$0xff]  ;;  %v5726_v9 = vld [vmem:[%s5518_s30 + $0xf0] sm:$0xff] }
  0x2a   : > { %4578 = vmatprep.subr.msk.bf16.mxu0 %vm5522_vm2, %v4576_v24  ;;  %v5723_v7 = vld [vmem:[%s5518_s30 + $0x68] sm:$0xff]  ;;  %v5729_v10 = vld [vmem:[%s5518_s30 + $0xf8] sm:$0xff]  ;;  %v4637_v11 = vpack.c.bf16 %v5717_v62, %v5711_v61  ;;  %v5742_v18 = vld [vmem:[%s5518_s30 + $0x170] sm:$0xff] }
  0x2b   : > { %v4603_v12 = vpack.c.bf16 %v5723_v7, %v5720_v63  ;;  %v4606_v15 = vpack.c.bf16 %v5729_v10, %v5726_v9  ;;  %v5748_v22 = vld [vmem:[%s5518_s30 + $0x178] sm:$0xff]  ;;  %v5751_v23 = vld [vmem:[%s5518_s30 + $0x70] sm:$0xff] }
  0x2c   : > { %v5754_v24 = vld [vmem:[%s5518_s30 + $0x78] sm:$0xff] }
  0x30   : > { %4623 = vmatpush3.bf16.xpose.msk.msra.mxu1 %vm5522_vm2, %v4621_v31  ;;  %v5757_v31 = vld [vmem:[%s5518_s30 + $0x81] sm:$0xff] }
  0x31   : > { %4581 = vmatpush3.bf16.xpose.msk.msra.mxu0 %vm5522_vm2, %v4579_v32  ;;  %4624 = vmatprep.subr.bf16.mxu1 %v7065_v1  ;;  %7152 = vst [vmem:[#allocation5_spill] sm:$0xff] %v5757_v31  ;;  %v5760_v32 = vld [vmem:[%s5518_s30 + $0x89] sm:$0xff] }
  0x32   : > { %4584 = vmatprep.subr.msk.bf16.mxu0 %vm5522_vm2, %v4582_v33  ;;  %7153 = vst [vmem:[#allocation6_spill] sm:$0xff] %v5760_v32  ;;  %v4641_v33 = vpack.c.bf16 %v5748_v22, %v5742_v18 }
  0x38   : > { %4627 = vmatpush3.bf16.xpose.msk.msra.mxu1 %vm5522_vm2, %v4625_v40  ;;  %v4609_v40 = vpack.c.bf16 %v5754_v24, %v5751_v23 }
  0x39   : > { %4587 = vmatpush3.bf16.xpose.msk.msra.mxu0 %vm5522_vm2, %v4585_v41  ;;  %4628 = vmatprep.subr.bf16.mxu1 %v7065_v1  ;;  %v4644_v41 = vpack.c.bf16 %v5760_v32, %v5757_v31  ;;  %v5864_v32 = vld [vmem:[%s5518_s30 + $0xb1] sm:$0xff] }
  0x3a   : > { %4590 = vmatprep.subr.msk.bf16.mxu0 %vm5522_vm2, %v4588_v42  ;;  %v5773_v42 = vld [vmem:[%s5518_s30 + $0x101] sm:$0xff]  ;;  %7163 = vst [vmem:[#allocation15_spill] sm:$0xff] %v5864_v32  ;;  %v5880_v31 = vld [vmem:[%s5518_s30 + $0x131] sm:$0xff] }
  0x3b   : > { %7154 = vst [vmem:[#allocation7_spill] sm:$0xff] %v5773_v42  ;;  %7165 = vst [vmem:[#allocation17_spill] sm:$0xff] %v5880_v31 }
  0x40   : > { %4631 = vmatpush3.bf16.xpose.msk.msra.mxu1 %vm5522_vm2, %v4629_v49  ;;  %v5779_v49 = vld [vmem:[%s5518_s30 + $0x109] sm:$0xff] }
  0x41   : > { %4593 = vmatpush3.bf16.xpose.msk.msra.mxu0 %vm5522_vm2, %v4591_v50  ;;  %4632 = vmatprep.subr.bf16.mxu1 %v7065_v1  ;;  %7155 = vst [vmem:[#allocation8_spill] sm:$0xff] %v5779_v49  ;;  %v516_v50 = vld [vmem:[%s5518_s30 + $0x1] sm:$0xff] }
  0x42   : > { %4596 = vmatprep.subr.msk.bf16.mxu0 %vm5522_vm2, %v4594_v51  ;;  %v517_v51 = vld [vmem:[%s5518_s30 + $0x9] sm:$0xff] }
  0x48   : > { %4635 = vmatpush3.bf16.xpose.msk.msra.mxu1 %vm5522_vm2, %v4633_v58  ;;  %v5784_v58 = vld [vmem:[%s5518_s30 + $0x91] sm:$0xff] }
  0x49   : > { %4599 = vmatpush3.bf16.xpose.msk.msra.mxu0 %vm5522_vm2, %v4597_v59  ;;  %4636 = vmatprep.subr.bf16.mxu1 %v7065_v1  ;;  %7156 = vst [vmem:[#allocation9_spill] sm:$0xff] %v5784_v58  ;;  %v5787_v59 = vld [vmem:[%s5518_s30 + $0x99] sm:$0xff] }
  0x4a   : > { %4602 = vmatprep.subr.msk.bf16.mxu0 %vm5522_vm2, %v4600_v60  ;;  %v4693_v60 = vpack.c.bf16 %v5779_v49, %v5773_v42  ;;  %v5886_v42 = vld [vmem:[%s5518_s30 + $0x139] sm:$0xff] }
  0x4b   : > { %7166 = vst [vmem:[#allocation18_spill] sm:$0xff] %v5886_v42 }
  0x50   : > { %4639 = vmatpush3.bf16.xpose.msk.msra.mxu1 %vm5522_vm2, %v4637_v11  ;;  %v4647_v11 = vpack.c.bf16 %v517_v51, %v516_v50  ;;  %v5813_v50 = vld [vmem:[%s5518_s30 + $0x111] sm:$0xff] }
  0x51   : > { %4605 = vmatpush3.bf16.xpose.msk.msra.mxu0 %vm5522_vm2, %v4603_v12  ;;  %4640 = vmatprep.subr.bf16.mxu1 %v7065_v1  ;;  %v4650_v12 = vpack.c.bf16 %v5787_v59, %v5784_v58  ;;  %7157 = vst [vmem:[#allocation10_spill] sm:$0xff] %v5813_v50  ;;  %v518_v51 = vld [vmem:[%s5518_s30 + $0x11] sm:$0xff]  ;;  %v5858_v58 = vld [vmem:[%s5518_s30 + $0x21] sm:$0xff] }
  0x52   : > { %4608 = vmatprep.subr.msk.bf16.mxu0 %vm5522_vm2, %v4606_v15  ;;  %v5833_v15 = vld [vmem:[%s5518_s30 + $0xa9] sm:$0xff]  ;;  %7161 = vst [vmem:[#allocation13_spill] sm:$0xff] %v5858_v58 }
  0x53   : > { %7158 = vst [vmem:[#allocation11_spill] sm:$0xff] %v5833_v15 }
  0x58   : > { %4643 = vmatpush3.bf16.xpose.msk.msra.mxu1 %vm5522_vm2, %v4641_v33  ;;  %v5823_v33 = vld [vmem:[%s5518_s30 + $0x19] sm:$0xff] }
  0x59   : > { %4611 = vmatpush3.bf16.xpose.msk.msra.mxu0 %vm5522_vm2, %v4609_v40  ;;  %4692 = vmatprep.subr.bf16.mxu1 %v7065_v1  ;;  %v5804_v40 = vld [vmem:[%s7062_s1 + $0x8] sm:$0xff] }
  0x5a   : > { %4646 = vmatprep.subr.msk.bf16.mxu0 %vm5522_vm2, %v4644_v41  ;;  %v5830_v41 = vld [vmem:[%s5518_s30 + $0xa1] sm:$0xff] }
  0x5f   : > { %4282 = vmatmul.mubr.msk.f32.vlgmr.msra.gmra.mrb[0].mxu1 %vm224_vm0, %v5507_v0 }
  0x60   : > { %3823 = vmatmul.mubr.msk.f32.vlgmr.msra.gmra.mrb[0].mxu0 %vm224_vm0, %v5507_v0  ;;  %4695 = vmatpush3.bf16.xpose.msk.msra.mxu1 %vm5522_vm2, %v4693_v60  ;;  %v5819_v0 = vld [vmem:[%s5518_s30 + $0x119] sm:$0xff]  ;;  %v4653_v60 = vpack.c.bf16 %v5823_v33, %v518_v51  ;;  %v5855_v51 = vld [vmem:[%s5518_s30 + $0x129] sm:$0xff] }
  0x61   : > { %4649 = vmatpush3.bf16.xpose.msk.msra.mxu0 %vm5522_vm2, %v4647_v11  ;;  %4696 = vmatprep.subr.bf16.mxu1 %v7065_v1  ;;  %v4656_v11 = vpack.c.bf16 %v5833_v15, %v5830_v41  ;;  %v5849_v1 = vld [vmem:[%s5518_s30 + $0x121] sm:$0xff]  ;;  %7160 = vst [vmem:[#allocation12_spill] sm:$0xff] %v5855_v51 }
  0x62   : > { %4652 = vmatprep.subr.msk.bf16.mxu0 %vm5522_vm2, %v4650_v12  ;;  %4316 = vmatprep.mubr.msk.f32.mxu1 %vm5431_vm1, %v7067_v2  ;;  %v4697_v12 = vpack.c.bf16 %v5819_v0, %v5813_v50  ;;  %v7159_v2 = vmov 0.0|0.0   ;;  %v4701_v50 = vpack.c.bf16 %v5855_v51, %v5849_v1  ;;  %v4705_v51 = vpack.c.bf16 %v5886_v42, %v5880_v31  ;;  %v5911_v15 = vld [vmem:[%s5518_s30 + $0x141] sm:$0xff]  ;;  %v5926_v42 = vld [vmem:[%s5518_s30 + $0xd1] sm:$0xff] }
  0x63   : > { %3873 = vmatprep.mubr.msk.f32.mxu0 %vm224_vm0, %v5804_v40  ;;  %7171 = vst [vmem:[#allocation23_spill] sm:$0xff] %v5911_v15  ;;  %7175 = vst [vmem:[#allocation27_spill] sm:$0xff] %v5926_v42  ;;  %v5942_v31 = vld [vmem:[%s5518_s30 + $0x151] sm:$0xff] }
  0x64   : > { %7177 = vst [vmem:[#allocation29_spill] sm:$0xff] %v5942_v31 }
  0x68   : > { %4699 = vmatpush3.bf16.xpose.msk.msra.mxu1 %vm5522_vm2, %v4697_v12  ;;  %v5861_v12 = vld [vmem:[%s5518_s30 + $0x29] sm:$0xff] }
  0x69   : > { %4655 = vmatpush3.bf16.xpose.msk.msra.mxu0 %vm5522_vm2, %v4653_v60  ;;  %4700 = vmatprep.subr.bf16.mxu1 %v7159_v2  ;;  %7162 = vst [vmem:[#allocation14_spill] sm:$0xff] %v5861_v12  ;;  %v5867_v60 = vld [vmem:[%s5518_s30 + $0xb9] sm:$0xff]  ;;  %v4659_v49 = vpack.c.bf16 %v5861_v12, %v5858_v58  ;;  %v5895_v12 = vld [vmem:[%s5518_s30 + $0xc1] sm:$0xff] }
  0x6a   : > { %4658 = vmatprep.subr.msk.bf16.mxu0 %vm5522_vm2, %v4656_v11  ;;  %7164 = vst [vmem:[#allocation16_spill] sm:$0xff] %v5867_v60  ;;  %v4662_v11 = vpack.c.bf16 %v5867_v60, %v5864_v32  ;;  %v5889_v60 = vld [vmem:[%s5518_s30 + $0x31] sm:$0xff]  ;;  %7169 = vst [vmem:[#allocation21_spill] sm:$0xff] %v5895_v12  ;;  %v6101_v58 = vld [vmem:[%s5518_s30 + $0x122] sm:$0xff] }
  0x6b   : > { %7167 = vst [vmem:[#allocation19_spill] sm:$0xff] %v5889_v60  ;;  %7205 = vst [vmem:[#allocation56_spill] sm:$0xff] %v6101_v58 }
  0x70   : > { %4703 = vmatpush3.bf16.xpose.msk.msra.mxu1 %vm5522_vm2, %v4701_v50  ;;  %v5892_v50 = vld [vmem:[%s5518_s30 + $0x39] sm:$0xff] }
  0x71   : > { %4661 = vmatpush3.bf16.xpose.msk.msra.mxu0 %vm5522_vm2, %v4659_v49  ;;  %4704 = vmatprep.subr.bf16.mxu1 %v7159_v2  ;;  %7168 = vst [vmem:[#allocation20_spill] sm:$0xff] %v5892_v50  ;;  %v5898_v49 = vld [vmem:[%s5518_s30 + $0xc9] sm:$0xff]  ;;  %v4665_v32 = vpack.c.bf16 %v5892_v50, %v5889_v60 }
  0x72   : > { %4664 = vmatprep.subr.msk.bf16.mxu0 %vm5522_vm2, %v4662_v11  ;;  %7170 = vst [vmem:[#allocation22_spill] sm:$0xff] %v5898_v49  ;;  %v4668_v11 = vpack.c.bf16 %v5898_v49, %v5895_v12  ;;  %v5917_v50 = vld [vmem:[%s5518_s30 + $0x149] sm:$0xff]  ;;  %v5920_v49 = vld [vmem:[%s5518_s30 + $0x41] sm:$0xff] }
  0x73   : > { %7172 = vst [vmem:[#allocation24_spill] sm:$0xff] %v5917_v50  ;;  %7173 = vst [vmem:[#allocation25_spill] sm:$0xff] %v5920_v49  ;;  %v4709_v12 = vpack.c.bf16 %v5917_v50, %v5911_v15  ;;  %v5957_v50 = vld [vmem:[%s5518_s30 + $0xe1] sm:$0xff] }
  0x74   : > { %7181 = vst [vmem:[#allocation33_spill] sm:$0xff] %v5957_v50  ;;  %v5973_v15 = vld [vmem:[%s5518_s30 + $0x161] sm:$0xff] }
  0x75   : > { %7183 = vst [vmem:[#allocation35_spill] sm:$0xff] %v5973_v15 }
  0x78   : > { %4707 = vmatpush3.bf16.xpose.msk.msra.mxu1 %vm5522_vm2, %v4705_v51  ;;  %v5923_v51 = vld [vmem:[%s5518_s30 + $0x49] sm:$0xff] }
  0x79   : > { %4667 = vmatpush3.bf16.xpose.msk.msra.mxu0 %vm5522_vm2, %v4665_v32  ;;  %4708 = vmatprep.subr.bf16.mxu1 %v7159_v2  ;;  %7174 = vst [vmem:[#allocation26_spill] sm:$0xff] %v5923_v51  ;;  %v5929_v32 = vld [vmem:[%s5518_s30 + $0xd9] sm:$0xff]  ;;  %v4671_v60 = vpack.c.bf16 %v5923_v51, %v5920_v49 }
  0x7a   : > { %4670 = vmatprep.subr.msk.bf16.mxu0 %vm5522_vm2, %v4668_v11  ;;  %7176 = vst [vmem:[#allocation28_spill] sm:$0xff] %v5929_v32  ;;  %v4674_v11 = vpack.c.bf16 %v5929_v32, %v5926_v42  ;;  %v5948_v51 = vld [vmem:[%s5518_s30 + $0x159] sm:$0xff]  ;;  %v5951_v32 = vld [vmem:[%s5518_s30 + $0x51] sm:$0xff] }
  0x7b   : > { %7178 = vst [vmem:[#allocation30_spill] sm:$0xff] %v5948_v51  ;;  %7179 = vst [vmem:[#allocation31_spill] sm:$0xff] %v5951_v32  ;;  %v4713_v42 = vpack.c.bf16 %v5948_v51, %v5942_v31  ;;  %v5988_v51 = vld [vmem:[%s5518_s30 + $0xf1] sm:$0xff] }
  0x7c   : > { %7187 = vst [vmem:[#allocation39_spill] sm:$0xff] %v5988_v51  ;;  %v6004_v31 = vld [vmem:[%s5518_s30 + $0x171] sm:$0xff] }
  0x7d   : > { %7189 = vst [vmem:[#allocation41_spill] sm:$0xff] %v6004_v31 }
  0x80   : > { %4711 = vmatpush3.bf16.xpose.msk.msra.mxu1 %vm5522_vm2, %v4709_v12  ;;  %v5954_v12 = vld [vmem:[%s5518_s30 + $0x59] sm:$0xff] }
  0x81   : > { %4673 = vmatpush3.bf16.xpose.msk.msra.mxu0 %vm5522_vm2, %v4671_v60  ;;  %4712 = vmatprep.subr.bf16.mxu1 %v7159_v2  ;;  %7180 = vst [vmem:[#allocation32_spill] sm:$0xff] %v5954_v12  ;;  %v5960_v60 = vld [vmem:[%s5518_s30 + $0xe9] sm:$0xff]  ;;  %v4677_v49 = vpack.c.bf16 %v5954_v12, %v5951_v32 }
  0x82   : > { %4676 = vmatprep.subr.msk.bf16.mxu0 %vm5522_vm2, %v4674_v11  ;;  %7182 = vst [vmem:[#allocation34_spill] sm:$0xff] %v5960_v60  ;;  %v4680_v11 = vpack.c.bf16 %v5960_v60, %v5957_v50  ;;  %v5979_v12 = vld [vmem:[%s5518_s30 + $0x169] sm:$0xff]  ;;  %v5982_v60 = vld [vmem:[%s5518_s30 + $0x61] sm:$0xff] }
  0x83   : > { %7184 = vst [vmem:[#allocation36_spill] sm:$0xff] %v5979_v12  ;;  %7185 = vst [vmem:[#allocation37_spill] sm:$0xff] %v5982_v60  ;;  %v4717_v50 = vpack.c.bf16 %v5979_v12, %v5973_v15  ;;  %v6019_v12 = vld [vmem:[%s5518_s30 + $0x82] sm:$0xff] }
  0x84   : > { %7193 = vst [vmem:[#allocation45_spill] sm:$0xff] %v6019_v12  ;;  %v6035_v15 = vld [vmem:[%s5518_s30 + $0x102] sm:$0xff] }
  0x85   : > { %7195 = vst [vmem:[#allocation47_spill] sm:$0xff] %v6035_v15 }
  0x88   : > { %4715 = vmatpush3.bf16.xpose.msk.msra.mxu1 %vm5522_vm2, %v4713_v42  ;;  %v5985_v42 = vld [vmem:[%s5518_s30 + $0x69] sm:$0xff] }
  0x89   : > { %4679 = vmatpush3.bf16.xpose.msk.msra.mxu0 %vm5522_vm2, %v4677_v49  ;;  %4716 = vmatprep.subr.bf16.mxu1 %v7159_v2  ;;  %7186 = vst [vmem:[#allocation38_spill] sm:$0xff] %v5985_v42  ;;  %v5991_v49 = vld [vmem:[%s5518_s30 + $0xf9] sm:$0xff]  ;;  %v4683_v32 = vpack.c.bf16 %v5985_v42, %v5982_v60 }
  0x8a   : > { %4682 = vmatprep.subr.msk.bf16.mxu0 %vm5522_vm2, %v4680_v11  ;;  %7188 = vst [vmem:[#allocation40_spill] sm:$0xff] %v5991_v49  ;;  %v4686_v11 = vpack.c.bf16 %v5991_v49, %v5988_v51  ;;  %v6010_v42 = vld [vmem:[%s5518_s30 + $0x179] sm:$0xff]  ;;  %v6013_v49 = vld [vmem:[%s5518_s30 + $0x71] sm:$0xff] }
  0x8b   : > { %7190 = vst [vmem:[#allocation42_spill] sm:$0xff] %v6010_v42  ;;  %7191 = vst [vmem:[#allocation43_spill] sm:$0xff] %v6013_v49  ;;  %v4721_v51 = vpack.c.bf16 %v6010_v42, %v6004_v31  ;;  %v6041_v42 = vld [vmem:[%s5518_s30 + $0x10a] sm:$0xff] }
  0x8c   : > { %7196 = vst [vmem:[#allocation48_spill] sm:$0xff] %v6041_v42  ;;  %v6062_v31 = vld [vmem:[%s7062_s1 + $0x10] sm:$0xff] }
  0x90   : > { %4719 = vmatpush3.bf16.xpose.msk.msra.mxu1 %vm5522_vm2, %v4717_v50  ;;  %v6016_v50 = vld [vmem:[%s5518_s30 + $0x79] sm:$0xff] }
  0x91   : > { %4685 = vmatpush3.bf16.xpose.msk.msra.mxu0 %vm5522_vm2, %v4683_v32  ;;  %4720 = vmatprep.subr.bf16.mxu1 %v7159_v2  ;;  %7192 = vst [vmem:[#allocation44_spill] sm:$0xff] %v6016_v50  ;;  %v6022_v32 = vld [vmem:[%s5518_s30 + $0x8a] sm:$0xff]  ;;  %v4689_v60 = vpack.c.bf16 %v6016_v50, %v6013_v49  ;;  %v857_v50 = vld [vmem:[%s5518_s30 + $0x2] sm:$0xff] }
  0x92   : > { %4688 = vmatprep.subr.msk.bf16.mxu0 %vm5522_vm2, %v4686_v11  ;;  %7194 = vst [vmem:[#allocation46_spill] sm:$0xff] %v6022_v32  ;;  %v4724_v11 = vpack.c.bf16 %v6022_v32, %v6019_v12  ;;  %v858_v32 = vld [vmem:[%s5518_s30 + $0xa] sm:$0xff]  ;;  %v6046_v12 = vld [vmem:[%s5518_s30 + $0x92] sm:$0xff] }
  0x93   : > { %7197 = vst [vmem:[#allocation49_spill] sm:$0xff] %v6046_v12  ;;  %v4727_v49 = vpack.c.bf16 %v858_v32, %v857_v50  ;;  %v6069_v50 = vld [vmem:[%s5518_s30 + $0x112] sm:$0xff] }
  0x94   : > { %7199 = vst [vmem:[#allocation51_spill] sm:$0xff] %v6069_v50  ;;  %v859_v32 = vld [vmem:[%s5518_s30 + $0x12] sm:$0xff] }
  0x98   : > { %4723 = vmatpush3.bf16.xpose.msk.msra.mxu1 %vm5522_vm2, %v4721_v51  ;;  %v6049_v51 = vld [vmem:[%s5518_s30 + $0x9a] sm:$0xff] }
  0x99   : > { %4691 = vmatpush3.bf16.xpose.msk.msra.mxu0 %vm5522_vm2, %v4689_v60  ;;  %4772 = vmatprep.subr.bf16.mxu1 %v7159_v2  ;;  %7198 = vst [vmem:[#allocation50_spill] sm:$0xff] %v6049_v51  ;;  %v4773_v60 = vpack.c.bf16 %v6041_v42, %v6035_v15  ;;  %v7204_v42 = vmov 0.0  }
  0x9a   : > { %4726 = vmatprep.subr.msk.bf16.mxu0 %vm5522_vm2, %v4724_v11  ;;  %v4730_v11 = vpack.c.bf16 %v6049_v51, %v6046_v12  ;;  %v6079_v12 = vld [vmem:[%s5518_s30 + $0x1a] sm:$0xff] }
  0x9b   : > { %7201 = vst [vmem:[#allocation53_spill] sm:$0xff] %v6079_v12  ;;  %v4733_v15 = vpack.c.bf16 %v6079_v12, %v859_v32  ;;  %v6107_v32 = vld [vmem:[%s5518_s30 + $0x12a] sm:$0xff] }
  0x9c   : > { %7206 = vst [vmem:[#allocation57_spill] sm:$0xff] %v6107_v32  ;;  %v4781_v12 = vpack.c.bf16 %v6107_v32, %v6101_v58  ;;  %v6147_v32 = vld [vmem:[%s5518_s30 + $0xc2] sm:$0xff] }
  0x9d   : > { %7215 = vst [vmem:[#allocation66_spill] sm:$0xff] %v6147_v32  ;;  %v6163_v58 = vld [vmem:[%s5518_s30 + $0x142] sm:$0xff] }
  0x9e   : > { %7217 = vst [vmem:[#allocation68_spill] sm:$0xff] %v6163_v58 }
  0x9f   : > { %4317 = vmatmul.mubr.msk.f32.vlgmr.msra.gmra.mrb[0].mxu1 %vm224_vm0, %v5804_v40 }
  0xa0   : > { %3874 = vmatmul.mubr.msk.f32.vlgmr.msra.gmra.mrb[0].mxu0 %vm224_vm0, %v5804_v40  ;;  %4775 = vmatpush3.bf16.xpose.msk.msra.mxu1 %vm5522_vm2, %v4773_v60  ;;  %v6075_v40 = vld [vmem:[%s5518_s30 + $0x11a] sm:$0xff]  ;;  %v6082_v60 = vld [vmem:[%s5518_s30 + $0xa2] sm:$0xff] }
  0xa1   : > { %4729 = vmatpush3.bf16.xpose.msk.msra.mxu0 %vm5522_vm2, %v4727_v49  ;;  %4776 = vmatprep.subr.bf16.mxu1 %v7159_v2  ;;  %7200 = vst [vmem:[#allocation52_spill] sm:$0xff] %v6075_v40  ;;  %7202 = vst [vmem:[#allocation54_spill] sm:$0xff] %v6082_v60  ;;  %v6085_v49 = vld [vmem:[%s5518_s30 + $0xaa] sm:$0xff] }
  0xa2   : > { %4732 = vmatprep.subr.msk.bf16.mxu0 %vm5522_vm2, %v4730_v11  ;;  %7203 = vst [vmem:[#allocation55_spill] sm:$0xff] %v6085_v49  ;;  %4351 = vmatprep.mubr.msk.f32.mxu1 %vm5431_vm1, %v7204_v42  ;;  %v4777_v11 = vpack.c.bf16 %v6075_v40, %v6069_v50  ;;  %v4736_v51 = vpack.c.bf16 %v6085_v49, %v6082_v60  ;;  %v6110_v50 = vld [vmem:[%s5518_s30 + $0x22] sm:$0xff]  ;;  %v6116_v49 = vld [vmem:[%s5518_s30 + $0xb2] sm:$0xff] }
  0xa3   : > { %3924 = vmatprep.mubr.msk.f32.mxu0 %vm224_vm0, %v6062_v31  ;;  %7207 = vst [vmem:[#allocation58_spill] sm:$0xff] %v6110_v50  ;;  %7209 = vst [vmem:[#allocation60_spill] sm:$0xff] %v6116_v49  ;;  %v6132_v60 = vld [vmem:[%s5518_s30 + $0x132] sm:$0xff] }
  0xa4   : > { %7211 = vst [vmem:[#allocation62_spill] sm:$0xff] %v6132_v60 }
  0xa8   : > { %4779 = vmatpush3.bf16.xpose.msk.msra.mxu1 %vm5522_vm2, %v4777_v11  ;;  %v6113_v11 = vld [vmem:[%s5518_s30 + $0x2a] sm:$0xff] }
  0xa9   : > { %4735 = vmatpush3.bf16.xpose.msk.msra.mxu0 %vm5522_vm2, %v4733_v15  ;;  %4780 = vmatprep.subr.bf16.mxu1 %v7159_v2  ;;  %7208 = vst [vmem:[#allocation59_spill] sm:$0xff] %v6113_v11  ;;  %v6119_v15 = vld [vmem:[%s5518_s30 + $0xba] sm:$0xff]  ;;  %v4739_v40 = vpack.c.bf16 %v6113_v11, %v6110_v50 }
  0xaa   : > { %4738 = vmatprep.subr.msk.bf16.mxu0 %vm5522_vm2, %v4736_v51  ;;  %7210 = vst [vmem:[#allocation61_spill] sm:$0xff] %v6119_v15  ;;  %v4742_v51 = vpack.c.bf16 %v6119_v15, %v6116_v49  ;;  %v6138_v11 = vld [vmem:[%s5518_s30 + $0x13a] sm:$0xff]  ;;  %v6141_v15 = vld [vmem:[%s5518_s30 + $0x32] sm:$0xff] }
  0xab   : > { %7212 = vst [vmem:[#allocation63_spill] sm:$0xff] %v6138_v11  ;;  %7213 = vst [vmem:[#allocation64_spill] sm:$0xff] %v6141_v15  ;;  %v4785_v49 = vpack.c.bf16 %v6138_v11, %v6132_v60  ;;  %v6178_v11 = vld [vmem:[%s5518_s30 + $0xd2] sm:$0xff] }
  0xac   : > { %7221 = vst [vmem:[#allocation72_spill] sm:$0xff] %v6178_v11  ;;  %v6194_v60 = vld [vmem:[%s5518_s30 + $0x152] sm:$0xff] }
  0xad   : > { %7223 = vst [vmem:[#allocation74_spill] sm:$0xff] %v6194_v60 }
  0xb0   : > { %4783 = vmatpush3.bf16.xpose.msk.msra.mxu1 %vm5522_vm2, %v4781_v12  ;;  %v6144_v12 = vld [vmem:[%s5518_s30 + $0x3a] sm:$0xff] }
  0xb1   : > { %4741 = vmatpush3.bf16.xpose.msk.msra.mxu0 %vm5522_vm2, %v4739_v40  ;;  %4784 = vmatprep.subr.bf16.mxu1 %v7159_v2  ;;  %7214 = vst [vmem:[#allocation65_spill] sm:$0xff] %v6144_v12  ;;  %v6150_v40 = vld [vmem:[%s5518_s30 + $0xca] sm:$0xff]  ;;  %v4745_v50 = vpack.c.bf16 %v6144_v12, %v6141_v15 }
  0xb2   : > { %4744 = vmatprep.subr.msk.bf16.mxu0 %vm5522_vm2, %v4742_v51  ;;  %7216 = vst [vmem:[#allocation67_spill] sm:$0xff] %v6150_v40  ;;  %v4748_v51 = vpack.c.bf16 %v6150_v40, %v6147_v32  ;;  %v6169_v12 = vld [vmem:[%s5518_s30 + $0x14a] sm:$0xff]  ;;  %v6172_v40 = vld [vmem:[%s5518_s30 + $0x42] sm:$0xff] }
  0xb3   : > { %7218 = vst [vmem:[#allocation69_spill] sm:$0xff] %v6169_v12  ;;  %7219 = vst [vmem:[#allocation70_spill] sm:$0xff] %v6172_v40  ;;  %v4789_v32 = vpack.c.bf16 %v6169_v12, %v6163_v58  ;;  %v6209_v12 = vld [vmem:[%s5518_s30 + $0xe2] sm:$0xff] }
  0xb4   : > { %7227 = vst [vmem:[#allocation78_spill] sm:$0xff] %v6209_v12  ;;  %v6225_v58 = vld [vmem:[%s5518_s30 + $0x162] sm:$0xff] }
  0xb5   : > { %7229 = vst [vmem:[#allocation80_spill] sm:$0xff] %v6225_v58 }
  0xb8   : > { %4787 = vmatpush3.bf16.xpose.msk.msra.mxu1 %vm5522_vm2, %v4785_v49  ;;  %v6175_v49 = vld [vmem:[%s5518_s30 + $0x4a] sm:$0xff] }
  0xb9   : > { %4747 = vmatpush3.bf16.xpose.msk.msra.mxu0 %vm5522_vm2, %v4745_v50  ;;  %4788 = vmatprep.subr.bf16.mxu1 %v7159_v2  ;;  %7220 = vst [vmem:[#allocation71_spill] sm:$0xff] %v6175_v49  ;;  %v6181_v50 = vld [vmem:[%s5518_s30 + $0xda] sm:$0xff]  ;;  %v4751_v15 = vpack.c.bf16 %v6175_v49, %v6172_v40 }
  0xba   : > { %4750 = vmatprep.subr.msk.bf16.mxu0 %vm5522_vm2, %v4748_v51  ;;  %7222 = vst [vmem:[#allocation73_spill] sm:$0xff] %v6181_v50  ;;  %v4754_v51 = vpack.c.bf16 %v6181_v50, %v6178_v11  ;;  %v6200_v49 = vld [vmem:[%s5518_s30 + $0x15a] sm:$0xff]  ;;  %v6203_v50 = vld [vmem:[%s5518_s30 + $0x52] sm:$0xff] }
  0xbb   : > { %7224 = vst [vmem:[#allocation75_spill] sm:$0xff] %v6200_v49  ;;  %7225 = vst [vmem:[#allocation76_spill] sm:$0xff] %v6203_v50  ;;  %v4793_v11 = vpack.c.bf16 %v6200_v49, %v6194_v60  ;;  %v6237_v49 = vld [vmem:[%s5518_s30 + $0x6a] sm:$0xff]  ;;  %v6256_v60 = vld [vmem:[%s5518_s30 + $0x172] sm:$0xff] }
  0xbc   : > { %7231 = vst [vmem:[#allocation82_spill] sm:$0xff] %v6237_v49 }
  0xc0   : > { %4791 = vmatpush3.bf16.xpose.msk.msra.mxu1 %vm5522_vm2, %v4789_v32  ;;  %v6206_v32 = vld [vmem:[%s5518_s30 + $0x5a] sm:$0xff] }
  0xc1   : > { %4753 = vmatpush3.bf16.xpose.msk.msra.mxu0 %vm5522_vm2, %v4751_v15  ;;  %4792 = vmatprep.subr.bf16.mxu1 %v7159_v2  ;;  %7226 = vst [vmem:[#allocation77_spill] sm:$0xff] %v6206_v32  ;;  %v6212_v15 = vld [vmem:[%s5518_s30 + $0xea] sm:$0xff]  ;;  %v4757_v40 = vpack.c.bf16 %v6206_v32, %v6203_v50 }
  0xc2   : > { %4756 = vmatprep.subr.msk.bf16.mxu0 %vm5522_vm2, %v4754_v51  ;;  %7228 = vst [vmem:[#allocation79_spill] sm:$0xff] %v6212_v15  ;;  %v4760_v51 = vpack.c.bf16 %v6212_v15, %v6209_v12  ;;  %v6231_v32 = vld [vmem:[%s5518_s30 + $0x16a] sm:$0xff]  ;;  %v6234_v15 = vld [vmem:[%s5518_s30 + $0x62] sm:$0xff]  ;;  %v6243_v12 = vld [vmem:[%s5518_s30 + $0xfa] sm:$0xff] }
  0xc3   : > { %7230 = vst [vmem:[#allocation81_spill] sm:$0xff] %v6231_v32  ;;  %7232 = vst [vmem:[#allocation83_spill] sm:$0xff] %v6243_v12  ;;  %v4763_v50 = vpack.c.bf16 %v6237_v49, %v6234_v15  ;;  %v6268_v49 = vld [vmem:[%s5518_s30 + $0x7a] sm:$0xff] }
  0xc8   : > { %4795 = vmatpush3.bf16.xpose.msk.msra.mxu1 %vm5522_vm2, %v4793_v11  ;;  %v6240_v11 = vld [vmem:[%s5518_s30 + $0xf2] sm:$0xff] }
  0xc9   : > { %4759 = vmatpush3.bf16.xpose.msk.msra.mxu0 %vm5522_vm2, %v4757_v40  ;;  %4796 = vmatprep.subr.bf16.mxu1 %v7159_v2  ;;  %v4797_v40 = vpack.c.bf16 %v6231_v32, %v6225_v58  ;;  %v6262_v32 = vld [vmem:[%s5518_s30 + $0x17a] sm:$0xff]  ;;  %v6265_v58 = vld [vmem:[%s5518_s30 + $0x72] sm:$0xff] }
  0xca   : > { %4762 = vmatprep.subr.msk.bf16.mxu0 %vm5522_vm2, %v4760_v51  ;;  %v4766_v51 = vpack.c.bf16 %v6243_v12, %v6240_v11  ;;  %v4801_v12 = vpack.c.bf16 %v6262_v32, %v6256_v60 }
  0xd0   : > { %4799 = vmatpush3.bf16.xpose.msk.msra.mxu1 %vm5522_vm2, %v4797_v40  ;;  %v4769_v40 = vpack.c.bf16 %v6268_v49, %v6265_v58 }
  0xd1   : > { %4765 = vmatpush3.bf16.xpose.msk.msra.mxu0 %vm5522_vm2, %v4763_v50  ;;  %4800 = vmatprep.subr.bf16.mxu1 %v7159_v2  ;;  %v7233_v50 = vpack.c.bf16 %v5572_v20, %v5548_v14  ;;  %v7235_v14 = vpack.c.bf16 %v5596_v27, %v5569_v19  ;;  %v7236_v20 = vpack.c.bf16 %v5602_v29, %v5575_v21 }
  0xd2   : > { %4768 = vmatprep.subr.msk.bf16.mxu0 %vm5522_vm2, %v4766_v51  ;;  %v7234_v51 = vpack.c.bf16 %v5587_v25, %v5565_v17  ;;  %v4813_v17 = vpack.c.bf16 %v5627_v36, %v5599_v28  ;;  %v4816_v19 = vpack.c.bf16 %v5633_v38, %v5605_v30  ;;  %v7237_v25 = vpack.c.bf16 %v5618_v34, %v5593_v26 }
  0xd3   : > { %v4861_v21 = vpack.c.bf16 %v5649_v43, %v5624_v35  ;;  %v4819_v27 = vpack.c.bf16 %v5658_v45, %v5630_v37  ;;  %v4822_v26 = vpack.c.bf16 %v5664_v47, %v5636_v39  ;;  %v4865_v28 = vpack.c.bf16 %v5680_v52, %v5655_v44  ;;  %v6377_v43 = vld [vmem:[%s5518_s30 + $0x180] sm:$0xff]  ;;  %v6396_v47 = vld [vmem:[%s5518_s30 + $0x190] sm:$0xff] }
  0xd4   : > { %v4825_v29 = vpack.c.bf16 %v5689_v54, %v5661_v46  ;;  %v4828_v30 = vpack.c.bf16 %v5695_v56, %v5667_v48  ;;  %v4869_v34 = vpack.c.bf16 %v5711_v61, %v5686_v53  ;;  %v4831_v35 = vpack.c.bf16 %v5720_v63, %v5692_v55  ;;  %v6393_v46 = vld [vmem:[%s5518_s30 + $0x188] sm:$0xff]  ;;  %v7238_v52 = vld [vmem:[#allocation13_spill] sm:$0xff]  ;;  %v7240_v53 = vld [vmem:[#allocation15_spill] sm:$0xff] }
  0xd5   : > { %v4834_v36 = vpack.c.bf16 %v5726_v9, %v5698_v57  ;;  %v4873_v37 = vpack.c.bf16 %v5742_v18, %v5717_v62  ;;  %v4837_v38 = vpack.c.bf16 %v5751_v23, %v5723_v7  ;;  %v4840_v39 = vpack.c.bf16 %v5533_v6, %v5729_v10  ;;  %v6422_v55 = vld [vmem:[%s7062_s1 + $0x20] sm:$0xff]  ;;  %v7242_v56 = vld [vmem:[#allocation17_spill] sm:$0xff]  ;;  %v7243_v61 = vld [vmem:[#allocation14_spill] sm:$0xff] }
  0xd6   : > { %v4877_v44 = vpack.c.bf16 %v6377_v43, %v5748_v22  ;;  %v4843_v45 = vpack.c.bf16 %v5527_v4, %v5754_v24  ;;  %v4846_v6 = vpack.c.bf16 %v5559_v16, %v5538_v8  ;;  %v4881_v4 = vpack.c.bf16 %v6396_v47, %v6393_v46  ;;  %v7244_v62 = vld [vmem:[#allocation19_spill] sm:$0xff]  ;;  %v7245_v7 = vld [vmem:[#allocation16_spill] sm:$0xff]  ;;  %v7246_v9 = vld [vmem:[#allocation21_spill] sm:$0xff] }
  0xd7   : > { %v4849_v8 = vpack.c.bf16 %v5545_v13, %v5530_v5  ;;  %v4884_v16 = vpack.c.bf16 %v5830_v41, %v5787_v59  ;;  %v4933_v48 = vpack.c.bf16 %v5849_v1, %v5819_v0  ;;  %v4887_v5 = vpack.c.bf16 %v7238_v52, %v5823_v33  ;;  %v7239_v13 = vld [vmem:[#allocation11_spill] sm:$0xff]  ;;  %v7241_v1 = vld [vmem:[#allocation12_spill] sm:$0xff]  ;;  %v7247_v18 = vld [vmem:[#allocation18_spill] sm:$0xff] }
  0xd8   : > { %4803 = vmatpush3.bf16.xpose.msk.msra.mxu1 %vm5522_vm2, %v4801_v12  ;;  %v3481_v12 = vld [vmem:[%s7062_s1 + $0x18] sm:$0xff]  ;;  %v4890_v54 = vpack.c.bf16 %v7240_v53, %v7239_v13  ;;  %v4937_v57 = vpack.c.bf16 %v7242_v56, %v7241_v1  ;;  %v4893_v63 = vpack.c.bf16 %v7244_v62, %v7243_v61  ;;  %v4896_v10 = vpack.c.bf16 %v7246_v9, %v7245_v7  ;;  %v7248_v22 = vld [vmem:[#allocation23_spill] sm:$0xff]  ;;  %v7249_v24 = vld [vmem:[#allocation20_spill] sm:$0xff] }
  0xd9   : > { %4771 = vmatpush3.bf16.xpose.msk.msra.mxu0 %vm5522_vm2, %v4769_v40  ;;  %4852 = vmatprep.subr.bf16.mxu1 %v7159_v2  ;;  %v4941_v23 = vpack.c.bf16 %v7248_v22, %v7247_v18  ;;  %v7251_v33 = vld [vmem:[#allocation22_spill] sm:$0xff]  ;;  %v7252_v41 = vld [vmem:[#allocation27_spill] sm:$0xff]  ;;  %v7253_v40 = vld [vmem:[#allocation24_spill] sm:$0xff] }
  0xda   : > { %4806 = vmatprep.subr.msk.bf16.mxu0 %vm5522_vm2, %v7233_v50  ;;  %v4902_v0 = vpack.c.bf16 %v7252_v41, %v7251_v33  ;;  %v7254_v50 = vld [vmem:[#allocation29_spill] sm:$0xff]  ;;  %v7271_v52 = vld [vmem:[#allocation42_spill] sm:$0xff]  ;;  %v7272_v13 = vld [vmem:[#allocation44_spill] sm:$0xff] }
  0xdb   : > { %v7273_v53 = vld [vmem:[#allocation5_spill] sm:$0xff]  ;;  %v7274_v1 = vld [vmem:[#allocation8_spill] sm:$0xff]  ;;  %v7275_v56 = vld [vmem:[#allocation10_spill] sm:$0xff] }
  0xdc   : > { %v6517_v61 = vld [vmem:[%s5518_s30 + $0x189] sm:$0xff]  ;;  %v6520_v62 = vld [vmem:[%s5518_s30 + $0x191] sm:$0xff] }
  0xdd   : > { %v7276_v7 = vld [vmem:[#allocation6_spill] sm:$0xff]  ;;  %v7277_v9 = vld [vmem:[#allocation9_spill] sm:$0xff] }
  0xde   : > { %v7278_v18 = vld [vmem:[#allocation50_spill] sm:$0xff]  ;;  %v7282_v33 = vld [vmem:[#allocation53_spill] sm:$0xff] }
  0xdf   : > { %4352 = vmatmul.mubr.msk.f32.vlgmr.msra.gmra.mrb[0].mxu1 %vm224_vm0, %v6062_v31  ;;  %v7279_v22 = vld [vmem:[#allocation54_spill] sm:$0xff] }
  0xe0   : > { %3925 = vmatmul.mubr.msk.f32.vlgmr.msra.gmra.mrb[0].mxu0 %vm224_vm0, %v6062_v31  ;;  %4855 = vmatpush3.bf16.xpose.msk.msra.mxu1 %vm5522_vm2, %v7234_v51  ;;  %v7250_v31 = vld [vmem:[#allocation25_spill] sm:$0xff]  ;;  %v7255_v51 = vld [vmem:[#allocation26_spill] sm:$0xff] }
  0xe1   : > { %4809 = vmatpush3.bf16.xpose.msk.msra.mxu0 %vm5522_vm2, %v7235_v14  ;;  %4856 = vmatprep.subr.bf16.mxu1 %v7159_v2  ;;  %v4899_v59 = vpack.c.bf16 %v7250_v31, %v7249_v24  ;;  %v7256_v14 = vld [vmem:[#allocation31_spill] sm:$0xff]  ;;  %v7280_v24 = vld [vmem:[#allocation52_spill] sm:$0xff]  ;;  %v7283_v41 = vld [vmem:[#allocation58_spill] sm:$0xff] }
  0xe2   : > { %4812 = vmatprep.subr.msk.bf16.mxu0 %vm5522_vm2, %v7236_v20  ;;  %4386 = vmatprep.mubr.msk.f32.mxu1 %vm5431_vm1, %v7204_v42  ;;  %v4905_v20 = vpack.c.bf16 %v7256_v14, %v7255_v51  ;;  %v7281_v31 = vld [vmem:[#allocation56_spill] sm:$0xff]  ;;  %v7287_v14 = vld [vmem:[#allocation62_spill] sm:$0xff] }
  0xe3   : > { %3975 = vmatprep.mubr.msk.f32.mxu0 %vm224_vm0, %v3481_v12  ;;  %v6548_v51 = vld [vmem:[%s7062_s1 + $0x28] sm:$0xff] }
  0xe8   : > { %4859 = vmatpush3.bf16.xpose.msk.msra.mxu1 %vm5522_vm2, %v7237_v25 }
  0xe9   : > { %4815 = vmatpush3.bf16.xpose.msk.msra.mxu0 %vm5522_vm2, %v4813_v17  ;;  %4860 = vmatprep.subr.bf16.mxu1 %v7159_v2  ;;  %v7257_v17 = vld [vmem:[#allocation28_spill] sm:$0xff] }
  0xea   : > { %4818 = vmatprep.subr.msk.bf16.mxu0 %vm5522_vm2, %v4816_v19  ;;  %v7258_v19 = vld [vmem:[#allocation33_spill] sm:$0xff] }
  0xeb   : > { %v4908_v25 = vpack.c.bf16 %v7258_v19, %v7257_v17  ;;  %v7288_v17 = vld [vmem:[#allocation59_spill] sm:$0xff]  ;;  %v7289_v19 = vld [vmem:[#allocation64_spill] sm:$0xff] }
  0xf0   : > { %4863 = vmatpush3.bf16.xpose.msk.msra.mxu1 %vm5522_vm2, %v4861_v21  ;;  %v7259_v21 = vld [vmem:[#allocation30_spill] sm:$0xff] }
  0xf1   : > { %4821 = vmatpush3.bf16.xpose.msk.msra.mxu0 %vm5522_vm2, %v4819_v27  ;;  %4864 = vmatprep.subr.bf16.mxu1 %v7159_v2  ;;  %v7260_v27 = vld [vmem:[#allocation35_spill] sm:$0xff] }
  0xf2   : > { %4824 = vmatprep.subr.msk.bf16.mxu0 %vm5522_vm2, %v4822_v26  ;;  %v4949_v26 = vpack.c.bf16 %v7260_v27, %v7259_v21  ;;  %v7290_v21 = vld [vmem:[#allocation61_spill] sm:$0xff]  ;;  %v7291_v27 = vld [vmem:[#allocation66_spill] sm:$0xff] }
  0xf8   : > { %4867 = vmatpush3.bf16.xpose.msk.msra.mxu1 %vm5522_vm2, %v4865_v28  ;;  %v7261_v28 = vld [vmem:[#allocation32_spill] sm:$0xff] }
  0xf9   : > { %4827 = vmatpush3.bf16.xpose.msk.msra.mxu0 %vm5522_vm2, %v4825_v29  ;;  %4868 = vmatprep.subr.bf16.mxu1 %v7159_v2  ;;  %v7262_v29 = vld [vmem:[#allocation37_spill] sm:$0xff] }
  0xfa   : > { %4830 = vmatprep.subr.msk.bf16.mxu0 %vm5522_vm2, %v4828_v30  ;;  %v4911_v30 = vpack.c.bf16 %v7262_v29, %v7261_v28  ;;  %v7292_v28 = vld [vmem:[#allocation63_spill] sm:$0xff]  ;;  %v7293_v29 = vld [vmem:[#allocation68_spill] sm:$0xff] }
 0x100   : > { %4871 = vmatpush3.bf16.xpose.msk.msra.mxu1 %vm5522_vm2, %v4869_v34  ;;  %v7263_v34 = vld [vmem:[#allocation34_spill] sm:$0xff] }
 0x101   : > { %4833 = vmatpush3.bf16.xpose.msk.msra.mxu0 %vm5522_vm2, %v4831_v35  ;;  %4872 = vmatprep.subr.bf16.mxu1 %v7159_v2  ;;  %v7264_v35 = vld [vmem:[#allocation39_spill] sm:$0xff] }
 0x102   : > { %4836 = vmatprep.subr.msk.bf16.mxu0 %vm5522_vm2, %v4834_v36  ;;  %v4914_v36 = vpack.c.bf16 %v7264_v35, %v7263_v34  ;;  %v7294_v34 = vld [vmem:[#allocation65_spill] sm:$0xff]  ;;  %v7295_v35 = vld [vmem:[#allocation70_spill] sm:$0xff] }
 0x108   : > { %4875 = vmatpush3.bf16.xpose.msk.msra.mxu1 %vm5522_vm2, %v4873_v37  ;;  %v7265_v37 = vld [vmem:[#allocation36_spill] sm:$0xff] }
 0x109   : > { %4839 = vmatpush3.bf16.xpose.msk.msra.mxu0 %vm5522_vm2, %v4837_v38  ;;  %4876 = vmatprep.subr.bf16.mxu1 %v7159_v2  ;;  %v7266_v38 = vld [vmem:[#allocation41_spill] sm:$0xff] }
 0x10a   : > { %4842 = vmatprep.subr.msk.bf16.mxu0 %vm5522_vm2, %v4840_v39  ;;  %v4953_v39 = vpack.c.bf16 %v7266_v38, %v7265_v37  ;;  %v7296_v37 = vld [vmem:[#allocation67_spill] sm:$0xff]  ;;  %v7297_v38 = vld [vmem:[#allocation72_spill] sm:$0xff] }
 0x110   : > { %4879 = vmatpush3.bf16.xpose.msk.msra.mxu1 %vm5522_vm2, %v4877_v44  ;;  %v7267_v44 = vld [vmem:[#allocation38_spill] sm:$0xff] }
 0x111   : > { %4845 = vmatpush3.bf16.xpose.msk.msra.mxu0 %vm5522_vm2, %v4843_v45  ;;  %4880 = vmatprep.subr.bf16.mxu1 %v7159_v2  ;;  %v7268_v45 = vld [vmem:[#allocation43_spill] sm:$0xff] }
 0x112   : > { %4848 = vmatprep.subr.msk.bf16.mxu0 %vm5522_vm2, %v4846_v6  ;;  %v4917_v6 = vpack.c.bf16 %v7268_v45, %v7267_v44  ;;  %v7298_v44 = vld [vmem:[#allocation69_spill] sm:$0xff]  ;;  %v7299_v45 = vld [vmem:[#allocation74_spill] sm:$0xff] }
 0x118   : > { %4883 = vmatpush3.bf16.xpose.msk.msra.mxu1 %vm5522_vm2, %v4881_v4  ;;  %v7269_v4 = vld [vmem:[#allocation40_spill] sm:$0xff] }
 0x119   : > { %4851 = vmatpush3.bf16.xpose.msk.msra.mxu0 %vm5522_vm2, %v4849_v8  ;;  %4932 = vmatprep.subr.bf16.mxu1 %v7159_v2  ;;  %v7270_v8 = vld [vmem:[#allocation7_spill] sm:$0xff] }
 0x11a   : > { %4886 = vmatprep.subr.msk.bf16.mxu0 %vm5522_vm2, %v4884_v16  ;;  %v4920_v16 = vpack.c.bf16 %v7270_v8, %v7269_v4  ;;  %v7300_v4 = vld [vmem:[#allocation71_spill] sm:$0xff]  ;;  %v7301_v8 = vld [vmem:[#allocation76_spill] sm:$0xff] }
 0x11f   : > { %4387 = vmatmul.mubr.msk.f32.vlgmr.msra.gmra.mrb[0].mxu1 %vm224_vm0, %v3481_v12 }
 0x120   : > { %3976 = vmatmul.mubr.msk.f32.vlgmr.msra.gmra.mrb[0].mxu0 %vm224_vm0, %v3481_v12  ;;  %4935 = vmatpush3.bf16.xpose.msk.msra.mxu1 %vm5522_vm2, %v4933_v48  ;;  %v4945_v12 = vpack.c.bf16 %v7254_v50, %v7253_v40  ;;  %v6501_v48 = vld [vmem:[%s5518_s30 + $0x181] sm:$0xff] }
 0x121   : > { %4889 = vmatpush3.bf16.xpose.msk.msra.mxu0 %vm5522_vm2, %v4887_v5  ;;  %4936 = vmatprep.subr.bf16.mxu1 %v7159_v2  ;;  %v4957_v5 = vpack.c.bf16 %v6501_v48, %v7271_v52  ;;  %v7284_v40 = vld [vmem:[#allocation55_spill] sm:$0xff]  ;;  %v7285_v50 = vld [vmem:[#allocation60_spill] sm:$0xff]  ;;  %v7302_v52 = vld [vmem:[#allocation73_spill] sm:$0xff] }
 0x122   : > { %4892 = vmatprep.subr.msk.bf16.mxu0 %vm5522_vm2, %v4890_v54  ;;  %4421 = vmatprep.mubr.msk.f32.mxu1 %vm5431_vm1, %v7204_v42  ;;  %v4923_v54 = vpack.c.bf16 %v7273_v53, %v7272_v13  ;;  %v7304_v53 = vld [vmem:[#allocation75_spill] sm:$0xff] }
 0x123   : > { %4026 = vmatprep.mubr.msk.f32.mxu0 %vm224_vm0, %v6422_v55 }
 0x128   : > { %4939 = vmatpush3.bf16.xpose.msk.msra.mxu1 %vm5522_vm2, %v4937_v57  ;;  %v4926_v57 = vpack.c.bf16 %v7275_v56, %v7274_v1  ;;  %v7306_v56 = vld [vmem:[#allocation77_spill] sm:$0xff] }
 0x129   : > { %4895 = vmatpush3.bf16.xpose.msk.msra.mxu0 %vm5522_vm2, %v4893_v63  ;;  %4940 = vmatprep.subr.bf16.mxu1 %v7159_v2  ;;  %v4961_v63 = vpack.c.bf16 %v6520_v62, %v6517_v61 }
 0x12a   : > { %4898 = vmatprep.subr.msk.bf16.mxu0 %vm5522_vm2, %v4896_v10  ;;  %v4929_v10 = vpack.c.bf16 %v7277_v9, %v7276_v7  ;;  %v7308_v9 = vld [vmem:[#allocation81_spill] sm:$0xff] }
 0x130   : > { %4943 = vmatpush3.bf16.xpose.msk.msra.mxu1 %vm5522_vm2, %v4941_v23  ;;  %v4964_v23 = vpack.c.bf16 %v7279_v22, %v7278_v18  ;;  %v7309_v18 = vld [vmem:[#allocation82_spill] sm:$0xff]  ;;  %v7311_v22 = vld [vmem:[#allocation47_spill] sm:$0xff] }
 0x131   : > { %4901 = vmatpush3.bf16.xpose.msk.msra.mxu0 %vm5522_vm2, %v4899_v59  ;;  %4944 = vmatprep.subr.bf16.mxu1 %v7159_v2  ;;  %v5013_v59 = vpack.c.bf16 %v7281_v31, %v7280_v24  ;;  %v7312_v24 = vld [vmem:[#allocation45_spill] sm:$0xff] }
 0x132   : > { %4904 = vmatprep.subr.msk.bf16.mxu0 %vm5522_vm2, %v4902_v0  ;;  %v4967_v0 = vpack.c.bf16 %v7283_v41, %v7282_v33  ;;  %v5003_v31 = vpack.c.bf16 %v7312_v24, %v6268_v49  ;;  %v7314_v33 = vld [vmem:[#allocation51_spill] sm:$0xff]  ;;  %v6646_v49 = vld [vmem:[%s5518_s30 + $0x192] sm:$0xff] }
 0x133   : > { %v2230_v24 = vld [vmem:[%s5518_s30 + $0x78] sm:$0xff] }
 0x138   : > { %4947 = vmatpush3.bf16.xpose.msk.msra.mxu1 %vm5522_vm2, %v4945_v12  ;;  %v4970_v12 = vpack.c.bf16 %v7285_v50, %v7284_v40  ;;  %v2238_v40 = vld [vmem:[%s5518_s30 + $0xb8] sm:$0xff] }
 0x139   : > { %4907 = vmatpush3.bf16.xpose.msk.msra.mxu0 %vm5522_vm2, %v4905_v20  ;;  %4948 = vmatprep.subr.bf16.mxu1 %v7159_v2 }
 0x13a   : > { %4910 = vmatprep.subr.msk.bf16.mxu0 %vm5522_vm2, %v4908_v25  ;;  %v4973_v25 = vpack.c.bf16 %v7289_v19, %v7288_v17  ;;  %v2253_v17 = vld [vmem:[%s5518_s30 + $0x130] sm:$0xff]  ;;  %v2254_v19 = vld [vmem:[%s5518_s30 + $0x138] sm:$0xff] }
 0x140   : > { %4951 = vmatpush3.bf16.xpose.msk.msra.mxu1 %vm5522_vm2, %v4949_v26  ;;  %v4976_v26 = vpack.c.bf16 %v7291_v27, %v7290_v21  ;;  %v2222_v21 = vld [vmem:[%s5518_s30 + $0x38] sm:$0xff]  ;;  %v2239_v27 = vld [vmem:[%s5518_s30 + $0xc0] sm:$0xff] }
 0x141   : > { %4913 = vmatpush3.bf16.xpose.msk.msra.mxu0 %vm5522_vm2, %v4911_v30  ;;  %4952 = vmatprep.subr.bf16.mxu1 %v7159_v2  ;;  %v5021_v30 = vpack.c.bf16 %v7293_v29, %v7292_v28  ;;  %v5093_v28 = vpack.c.bf16 %v2254_v19, %v2253_v17  ;;  %v2266_v19 = vld [vmem:[%s5518_s30 + $0x198] sm:$0xff] }
 0x142   : > { %4916 = vmatprep.subr.msk.bf16.mxu0 %vm5522_vm2, %v4914_v36  ;;  %v4979_v36 = vpack.c.bf16 %v7295_v35, %v7294_v34  ;;  %v6674_v34 = vld [vmem:[%s7062_s1 + $0x30] sm:$0xff]  ;;  %v2255_v35 = vld [vmem:[%s5518_s30 + $0x140] sm:$0xff] }
 0x148   : > { %4955 = vmatpush3.bf16.xpose.msk.msra.mxu1 %vm5522_vm2, %v4953_v39  ;;  %v4982_v39 = vpack.c.bf16 %v7297_v38, %v7296_v37  ;;  %v2224_v37 = vld [vmem:[%s5518_s30 + $0x48] sm:$0xff]  ;;  %v2241_v38 = vld [vmem:[%s5518_s30 + $0xd0] sm:$0xff] }
 0x149   : > { %4919 = vmatpush3.bf16.xpose.msk.msra.mxu0 %vm5522_vm2, %v4917_v6  ;;  %4956 = vmatprep.subr.bf16.mxu1 %v7159_v2  ;;  %v5025_v6 = vpack.c.bf16 %v7299_v45, %v7298_v44 }
 0x14a   : > { %4922 = vmatprep.subr.msk.bf16.mxu0 %vm5522_vm2, %v4920_v16  ;;  %v4985_v16 = vpack.c.bf16 %v7301_v8, %v7300_v4  ;;  %v2257_v4 = vld [vmem:[%s5518_s30 + $0x150] sm:$0xff]  ;;  %v2258_v8 = vld [vmem:[%s5518_s30 + $0x158] sm:$0xff] }
 0x150   : > { %4959 = vmatpush3.bf16.xpose.msk.msra.mxu1 %vm5522_vm2, %v4957_v5  ;;  %v7303_v5 = vld [vmem:[#allocation78_spill] sm:$0xff] }
 0x151   : > { %4925 = vmatpush3.bf16.xpose.msk.msra.mxu0 %vm5522_vm2, %v4923_v54  ;;  %4960 = vmatprep.subr.bf16.mxu1 %v7159_v2  ;;  %v4988_v13 = vpack.c.bf16 %v7303_v5, %v7302_v52  ;;  %v7305_v54 = vld [vmem:[#allocation80_spill] sm:$0xff]  ;;  %v2226_v52 = vld [vmem:[%s5518_s30 + $0x58] sm:$0xff]  ;;  %v2243_v5 = vld [vmem:[%s5518_s30 + $0xe0] sm:$0xff] }
 0x152   : > { %4928 = vmatprep.subr.msk.bf16.mxu0 %vm5522_vm2, %v4926_v57  ;;  %v5029_v1 = vpack.c.bf16 %v7305_v54, %v7304_v53  ;;  %v4991_v57 = vpack.c.bf16 %v6234_v15, %v7306_v56  ;;  %v4997_v15 = vpack.c.bf16 %v6265_v58, %v7309_v18  ;;  %v5101_v53 = vpack.c.bf16 %v2258_v8, %v2257_v4  ;;  %v2259_v56 = vld [vmem:[%s5518_s30 + $0x160] sm:$0xff] }
 0x153   : > { %v2563_v4 = vld [vmem:[%s5518_s30 + $0x39] sm:$0xff]  ;;  %v2580_v8 = vld [vmem:[%s5518_s30 + $0xc1] sm:$0xff] }
 0x158   : > { %4963 = vmatpush3.bf16.xpose.msk.msra.mxu1 %vm5522_vm2, %v4961_v63  ;;  %v7307_v63 = vld [vmem:[#allocation79_spill] sm:$0xff] }
 0x159   : > { %4931 = vmatpush3.bf16.xpose.msk.msra.mxu0 %vm5522_vm2, %v4929_v10  ;;  %5012 = vmatprep.subr.bf16.mxu1 %v7159_v2  ;;  %v4994_v7 = vpack.c.bf16 %v6240_v11, %v7307_v63  ;;  %v5033_v10 = vpack.c.bf16 %v6256_v60, %v7308_v9  ;;  %v7310_v11 = vld [vmem:[#allocation83_spill] sm:$0xff]  ;;  %v2245_v9 = vld [vmem:[%s5518_s30 + $0xf0] sm:$0xff] }
 0x15a   : > { %4966 = vmatprep.subr.msk.bf16.mxu0 %vm5522_vm2, %v4964_v23  ;;  %v5000_v23 = vpack.c.bf16 %v7311_v22, %v7310_v11  ;;  %v6627_v60 = vld [vmem:[%s5518_s30 + $0x182] sm:$0xff]  ;;  %v2261_v22 = vld [vmem:[%s5518_s30 + $0x170] sm:$0xff] }
 0x15b   : > { %v5037_v58 = vpack.c.bf16 %v6627_v60, %v6262_v32  ;;  %v6643_v32 = vld [vmem:[%s5518_s30 + $0x18a] sm:$0xff]  ;;  %v2227_v63 = vld [vmem:[%s5518_s30 + $0x60] sm:$0xff] }
 0x15c   : > { %v5041_v50 = vpack.c.bf16 %v6646_v49, %v6643_v32 }
 0x15f   : > { %4422 = vmatmul.mubr.msk.f32.vlgmr.msra.gmra.mrb[0].mxu1 %vm224_vm0, %v6422_v55 }
 0x160   : > { %4027 = vmatmul.mubr.msk.f32.vlgmr.msra.gmra.mrb[0].mxu0 %vm224_vm0, %v6422_v55  ;;  %5015 = vmatpush3.bf16.xpose.msk.msra.mxu1 %vm5522_vm2, %v5013_v59  ;;  %v7286_v55 = vld [vmem:[#allocation57_spill] sm:$0xff]  ;;  %v7313_v59 = vld [vmem:[#allocation48_spill] sm:$0xff] }
 0x161   : > { %4969 = vmatpush3.bf16.xpose.msk.msra.mxu0 %vm5522_vm2, %v4967_v0  ;;  %5016 = vmatprep.subr.bf16.mxu1 %v7159_v2  ;;  %v5017_v20 = vpack.c.bf16 %v7287_v14, %v7286_v55  ;;  %v5006_v41 = vpack.c.bf16 %v7314_v33, %v7313_v59  ;;  %v2237_v0 = vld [vmem:[%s5518_s30 + $0xb0] sm:$0xff]  ;;  %v2248_v59 = vld [vmem:[%s5518_s30 + $0x108] sm:$0xff] }
 0x162   : > { %4972 = vmatprep.subr.msk.bf16.mxu0 %vm5522_vm2, %v4970_v12  ;;  %4456 = vmatprep.mubr.msk.f32.mxu1 %vm5431_vm1, %v7204_v42  ;;  %v7315_v12 = vld [vmem:[#allocation46_spill] sm:$0xff]  ;;  %v7316_v55 = vld [vmem:[#allocation49_spill] sm:$0xff] }
 0x163   : > { %4077 = vmatprep.mubr.msk.f32.mxu0 %vm224_vm0, %v6548_v51  ;;  %v5009_v14 = vpack.c.bf16 %v7316_v55, %v7315_v12  ;;  %v2249_v12 = vld [vmem:[%s5518_s30 + $0x110] sm:$0xff]  ;;  %v2250_v55 = vld [vmem:[%s5518_s30 + $0x118] sm:$0xff] }
 0x164   : > { %v5080_v17 = vpack.c.bf16 %v2250_v55, %v2249_v12  ;;  %v2569_v12 = vld [vmem:[%s5518_s30 + $0x69] sm:$0xff]  ;;  %v2586_v55 = vld [vmem:[%s5518_s30 + $0xf1] sm:$0xff] }
 0x168   : > { %5019 = vmatpush3.bf16.xpose.msk.msra.mxu1 %vm5522_vm2, %v5017_v20  ;;  %v5044_v20 = vpack.c.bf16 %v2238_v40, %v2237_v0  ;;  %v2231_v40 = vld [vmem:[%s5518_s30 + $0x80] sm:$0xff] }
 0x169   : > { %4975 = vmatpush3.bf16.xpose.msk.msra.mxu0 %vm5522_vm2, %v4973_v25  ;;  %5020 = vmatprep.subr.bf16.mxu1 %v7159_v2  ;;  %v2221_v25 = vld [vmem:[%s5518_s30 + $0x30] sm:$0xff] }
 0x16a   : > { %4978 = vmatprep.subr.msk.bf16.mxu0 %vm5522_vm2, %v4976_v26  ;;  %v2240_v26 = vld [vmem:[%s5518_s30 + $0xc8] sm:$0xff]  ;;  %v5047_v29 = vpack.c.bf16 %v2222_v21, %v2221_v25  ;;  %v2251_v25 = vld [vmem:[%s5518_s30 + $0x120] sm:$0xff] }
 0x16b   : > { %v2252_v21 = vld [vmem:[%s5518_s30 + $0x128] sm:$0xff] }
 0x170   : > { %5023 = vmatpush3.bf16.xpose.msk.msra.mxu1 %vm5522_vm2, %v5021_v30  ;;  %v5050_v30 = vpack.c.bf16 %v2240_v26, %v2239_v27  ;;  %v5117_v27 = vpack.c.bf16 %v2266_v19, %v6396_v47  ;;  %v2235_v47 = vld [vmem:[%s5518_s30 + $0xa0] sm:$0xff] }
 0x171   : > { %4981 = vmatpush3.bf16.xpose.msk.msra.mxu0 %vm5522_vm2, %v4979_v36  ;;  %5024 = vmatprep.subr.bf16.mxu1 %v7159_v2  ;;  %v2223_v36 = vld [vmem:[%s5518_s30 + $0x40] sm:$0xff] }
 0x172   : > { %4984 = vmatprep.subr.msk.bf16.mxu0 %vm5522_vm2, %v4982_v39  ;;  %v2242_v39 = vld [vmem:[%s5518_s30 + $0xd8] sm:$0xff]  ;;  %v5053_v45 = vpack.c.bf16 %v2224_v37, %v2223_v36 }
 0x173   : > { %v2579_v36 = vld [vmem:[%s5518_s30 + $0xb9] sm:$0xff] }
 0x178   : > { %5027 = vmatpush3.bf16.xpose.msk.msra.mxu1 %vm5522_vm2, %v5025_v6  ;;  %v5056_v6 = vpack.c.bf16 %v2242_v39, %v2241_v38 }
 0x179   : > { %4987 = vmatpush3.bf16.xpose.msk.msra.mxu0 %vm5522_vm2, %v4985_v16  ;;  %5028 = vmatprep.subr.bf16.mxu1 %v7159_v2  ;;  %v2225_v16 = vld [vmem:[%s5518_s30 + $0x50] sm:$0xff] }
 0x17a   : > { %4990 = vmatprep.subr.msk.bf16.mxu0 %vm5522_vm2, %v4988_v13  ;;  %v2244_v13 = vld [vmem:[%s5518_s30 + $0xe8] sm:$0xff]  ;;  %v5059_v54 = vpack.c.bf16 %v2226_v52, %v2225_v16 }
 0x17b   : > { %v2581_v16 = vld [vmem:[%s5518_s30 + $0xc9] sm:$0xff] }
 0x180   : > { %5031 = vmatpush3.bf16.xpose.msk.msra.mxu1 %vm5522_vm2, %v5029_v1  ;;  %v5062_v1 = vpack.c.bf16 %v2244_v13, %v2243_v5  ;;  %v5130_v13 = vpack.c.bf16 %v2581_v16, %v2580_v8 }
 0x181   : > { %4993 = vmatpush3.bf16.xpose.msk.msra.mxu0 %vm5522_vm2, %v4991_v57  ;;  %5032 = vmatprep.subr.bf16.mxu1 %v7159_v2  ;;  %v2260_v57 = vld [vmem:[%s5518_s30 + $0x168] sm:$0xff] }
 0x182   : > { %4996 = vmatprep.subr.msk.bf16.mxu0 %vm5522_vm2, %v4994_v7  ;;  %v2228_v7 = vld [vmem:[%s5518_s30 + $0x68] sm:$0xff]  ;;  %v5105_v18 = vpack.c.bf16 %v2260_v57, %v2259_v56  ;;  %v169_v57 = vld [vmem:[%s7063_s2] sm:$0xff] }
 0x183   : > { %v2565_v56 = vld [vmem:[%s5518_s30 + $0x49] sm:$0xff] }
 0x188   : > { %5035 = vmatpush3.bf16.xpose.msk.msra.mxu1 %vm5522_vm2, %v5033_v10  ;;  %v2246_v10 = vld [vmem:[%s5518_s30 + $0xf8] sm:$0xff] }
 0x189   : > { %4999 = vmatpush3.bf16.xpose.msk.msra.mxu0 %vm5522_vm2, %v4997_v15  ;;  %5036 = vmatprep.subr.bf16.mxu1 %v7159_v2  ;;  %v5065_v15 = vpack.c.bf16 %v2228_v7, %v2227_v63  ;;  %v5068_v11 = vpack.c.bf16 %v2246_v10, %v2245_v9  ;;  %v2582_v63 = vld [vmem:[%s5518_s30 + $0xd1] sm:$0xff]  ;;  %v2583_v7 = vld [vmem:[%s5518_s30 + $0xd9] sm:$0xff]  ;;  %v5433_v9 = vmov 0  }
 0x18a   : > { %5002 = vmatprep.subr.msk.bf16.mxu0 %vm5522_vm2, %v5000_v23  ;;  %v2262_v23 = vld [vmem:[%s5518_s30 + $0x178] sm:$0xff]  ;;  %5365 = vset.pattern.permute.xlu0 %v5433_v9 }
 0x18b   : > { %v5109_v33 = vpack.c.bf16 %v2262_v23, %v2261_v22  ;;  %172 = vperm.xlu0 %5365, %v169_v57   ;;  %v2599_v22 = vld [vmem:[%s5518_s30 + $0x159] sm:$0xff]  ;;  %v2566_v23 = vld [vmem:[%s5518_s30 + $0x51] sm:$0xff] }
 0x18c   : > { %v2903_v9 = vld [vmem:[%s5518_s30 + $0x32] sm:$0xff] }
 0x190   : > { %5039 = vmatpush3.bf16.xpose.msk.msra.mxu1 %vm5522_vm2, %v5037_v58  ;;  %v2229_v58 = vld [vmem:[%s5518_s30 + $0x70] sm:$0xff] }
 0x191   : > { %5005 = vmatpush3.bf16.xpose.msk.msra.mxu0 %vm5522_vm2, %v5003_v31  ;;  %5040 = vmatprep.subr.bf16.mxu1 %v7159_v2  ;;  %v2247_v31 = vld [vmem:[%s5518_s30 + $0x100] sm:$0xff] }
 0x192   : > { %5008 = vmatprep.subr.msk.bf16.mxu0 %vm5522_vm2, %v5006_v41  ;;  %v5071_v41 = vpack.c.bf16 %v2230_v24, %v2229_v58  ;;  %v5074_v0 = vpack.c.bf16 %v2248_v59, %v2247_v31  ;;  %v2567_v58 = vld [vmem:[%s5518_s30 + $0x59] sm:$0xff]  ;;  %v2584_v24 = vld [vmem:[%s5518_s30 + $0xe1] sm:$0xff]  ;;  %v2585_v31 = vld [vmem:[%s5518_s30 + $0xe9] sm:$0xff] }
 0x198   : > { %5043 = vmatpush3.bf16.xpose.msk.msra.mxu1 %vm5522_vm2, %v5041_v50  ;;  %v2232_v50 = vld [vmem:[%s5518_s30 + $0x88] sm:$0xff] }
 0x199   : > { %5011 = vmatpush3.bf16.xpose.msk.msra.mxu0 %vm5522_vm2, %v5009_v14  ;;  %5092 = vmatprep.subr.bf16.mxu1 %v7159_v2  ;;  %v5113_v14 = vpack.c.bf16 %v6393_v46, %v6377_v43  ;;  %v2233_v43 = vld [vmem:[%s5518_s30 + $0x90] sm:$0xff]  ;;  %v2234_v46 = vld [vmem:[%s5518_s30 + $0x98] sm:$0xff] }
 0x19a   : > { %5046 = vmatprep.subr.msk.bf16.mxu0 %vm5522_vm2, %v5044_v20  ;;  %v5077_v20 = vpack.c.bf16 %v2232_v50, %v2231_v40  ;;  %v5083_v26 = vpack.c.bf16 %v2234_v46, %v2233_v43  ;;  %v2601_v40 = vld [vmem:[%s5518_s30 + $0x169] sm:$0xff]  ;;  %v2568_v50 = vld [vmem:[%s5518_s30 + $0x61] sm:$0xff]  ;;  %v2602_v43 = vld [vmem:[%s5518_s30 + $0x171] sm:$0xff] }
 0x19b   : > { %v2603_v46 = vld [vmem:[%s5518_s30 + $0x179] sm:$0xff] }
 0x19f   : > { %4457 = vmatmul.mubr.msk.f32.vlgmr.msra.gmra.mrb[0].mxu1 %vm224_vm0, %v6548_v51 }
 0x1a0   : > { %4078 = vmatmul.mubr.msk.f32.vlgmr.msra.gmra.mrb[0].mxu0 %vm224_vm0, %v6548_v51  ;;  %5095 = vmatpush3.bf16.xpose.msk.msra.mxu1 %vm5522_vm2, %v5093_v28  ;;  %v2256_v51 = vld [vmem:[%s5518_s30 + $0x148] sm:$0xff]  ;;  %v5086_v28 = vpack.c.bf16 %v2252_v21, %v2251_v25  ;;  %v2570_v25 = vld [vmem:[%s5518_s30 + $0x71] sm:$0xff]  ;;  %v2571_v21 = vld [vmem:[%s5518_s30 + $0x79] sm:$0xff] }
 0x1a1   : > { %5049 = vmatpush3.bf16.xpose.msk.msra.mxu0 %vm5522_vm2, %v5047_v29  ;;  %5096 = vmatprep.subr.bf16.mxu1 %v7159_v2  ;;  %v5097_v44 = vpack.c.bf16 %v2256_v51, %v2255_v35  ;;  %v2267_v29 = vld [vmem:[%s5518_s30 + $0x1a0] sm:$0xff]  ;;  %v2236_v35 = vld [vmem:[%s5518_s30 + $0xa8] sm:$0xff]  ;;  %v2578_v51 = vld [vmem:[%s5518_s30 + $0xb1] sm:$0xff] }
 0x1a2   : > { %5052 = vmatprep.subr.msk.bf16.mxu0 %vm5522_vm2, %v5050_v30  ;;  %4491 = vmatprep.mubr.msk.f32.mxu1 %vm5431_vm1, %v7204_v42  ;;  %v2268_v30 = vld [vmem:[%s5518_s30 + $0x1a8] sm:$0xff]  ;;  %v5089_v38 = vpack.c.bf16 %v2236_v35, %v2235_v47  ;;  %v5124_v39 = vpack.c.bf16 %v2579_v36, %v2578_v51  ;;  %v2590_v51 = vld [vmem:[%s5518_s30 + $0x111] sm:$0xff]  ;;  %v2591_v36 = vld [vmem:[%s5518_s30 + $0x119] sm:$0xff] }
 0x1a3   : > { %4128 = vmatprep.mubr.msk.f32.mxu0 %vm224_vm0, %v6674_v34  ;;  %v5121_v37 = vpack.c.bf16 %v2268_v30, %v2267_v29  ;;  %v5151_v29 = vpack.c.bf16 %v2571_v21, %v2570_v25  ;;  %v2572_v47 = vld [vmem:[%s5518_s30 + $0x81] sm:$0xff]  ;;  %v2573_v35 = vld [vmem:[%s5518_s30 + $0x89] sm:$0xff] }
 0x1a4   : > { %v2941_v25 = vld [vmem:[%s5518_s30 + $0x162] sm:$0xff]  ;;  %v2942_v21 = vld [vmem:[%s5518_s30 + $0x16a] sm:$0xff] }
 0x1a8   : > { %5099 = vmatpush3.bf16.xpose.msk.msra.mxu1 %vm5522_vm2, %v5097_v44  ;;  %v2594_v44 = vld [vmem:[%s5518_s30 + $0x131] sm:$0xff] }
 0x1a9   : > { %5055 = vmatpush3.bf16.xpose.msk.msra.mxu0 %vm5522_vm2, %v5053_v45  ;;  %5100 = vmatprep.subr.bf16.mxu1 %v7159_v2  ;;  %v2595_v45 = vld [vmem:[%s5518_s30 + $0x139] sm:$0xff] }
 0x1aa   : > { %5058 = vmatprep.subr.msk.bf16.mxu0 %vm5522_vm2, %v5056_v6  ;;  %v2562_v6 = vld [vmem:[%s5518_s30 + $0x31] sm:$0xff]  ;;  %v5173_v52 = vpack.c.bf16 %v2595_v45, %v2594_v44  ;;  %v2607_v44 = vld [vmem:[%s5518_s30 + $0x199] sm:$0xff]  ;;  %v2592_v45 = vld [vmem:[%s5518_s30 + $0x121] sm:$0xff] }
 0x1ab   : > { %v5127_v5 = vpack.c.bf16 %v2563_v4, %v2562_v6  ;;  %v2593_v6 = vld [vmem:[%s5518_s30 + $0x129] sm:$0xff]  ;;  %v5197_v4 = vpack.c.bf16 %v2607_v44, %v6520_v62  ;;  %v2576_v62 = vld [vmem:[%s5518_s30 + $0xa1] sm:$0xff] }
 0x1ac   : > { %v5166_v16 = vpack.c.bf16 %v2593_v6, %v2592_v45  ;;  %v2930_v44 = vld [vmem:[%s5518_s30 + $0x10a] sm:$0xff]  ;;  %v2913_v6 = vld [vmem:[%s5518_s30 + $0x82] sm:$0xff] }
 0x1b0   : > { %5103 = vmatpush3.bf16.xpose.msk.msra.mxu1 %vm5522_vm2, %v5101_v53  ;;  %v6791_v53 = vld [vmem:[%s7062_s1 + $0x38] sm:$0xff] }
 0x1b1   : > { %5061 = vmatpush3.bf16.xpose.msk.msra.mxu0 %vm5522_vm2, %v5059_v54  ;;  %5104 = vmatprep.subr.bf16.mxu1 %v7159_v2  ;;  %v2596_v54 = vld [vmem:[%s5518_s30 + $0x141] sm:$0xff] }
 0x1b2   : > { %5064 = vmatprep.subr.msk.bf16.mxu0 %vm5522_vm2, %v5062_v1  ;;  %v2597_v1 = vld [vmem:[%s5518_s30 + $0x149] sm:$0xff] }
 0x1b3   : > { %v5177_v10 = vpack.c.bf16 %v2597_v1, %v2596_v54  ;;  %v2919_v54 = vld [vmem:[%s5518_s30 + $0xb2] sm:$0xff]  ;;  %v2920_v1 = vld [vmem:[%s5518_s30 + $0xba] sm:$0xff] }
 0x1b4   : > { %v5204_v57 = vpack.c.bf16 %v2920_v1, %v2919_v54  ;;  %v2915_v54 = vld [vmem:[%s5518_s30 + $0x92] sm:$0xff]  ;;  %v2934_v1 = vld [vmem:[%s5518_s30 + $0x12a] sm:$0xff] }
 0x1b8   : > { %5107 = vmatpush3.bf16.xpose.msk.msra.mxu1 %vm5522_vm2, %v5105_v18 }
 0x1b9   : > { %5067 = vmatpush3.bf16.xpose.msk.msra.mxu0 %vm5522_vm2, %v5065_v15  ;;  %5108 = vmatprep.subr.bf16.mxu1 %v7159_v2  ;;  %v5136_v15 = vpack.c.bf16 %v2583_v7, %v2582_v63  ;;  %v2935_v63 = vld [vmem:[%s5518_s30 + $0x132] sm:$0xff]  ;;  %v2936_v7 = vld [vmem:[%s5518_s30 + $0x13a] sm:$0xff] }
 0x1ba   : > { %5070 = vmatprep.subr.msk.bf16.mxu0 %vm5522_vm2, %v5068_v11  ;;  %v2598_v11 = vld [vmem:[%s5518_s30 + $0x151] sm:$0xff] }
 0x1bb   : > { %v5181_v59 = vpack.c.bf16 %v2599_v22, %v2598_v11  ;;  %v5253_v11 = vpack.c.bf16 %v2936_v7, %v2935_v63  ;;  %v2949_v63 = vld [vmem:[%s5518_s30 + $0x1a2] sm:$0xff]  ;;  %v2950_v7 = vld [vmem:[%s5518_s30 + $0x1aa] sm:$0xff] }
 0x1c0   : > { %5111 = vmatpush3.bf16.xpose.msk.msra.mxu1 %vm5522_vm2, %v5109_v33  ;;  %v5139_v33 = vpack.c.bf16 %v2567_v58, %v2566_v23  ;;  %v6911_v58 = vld [vmem:[%s7062_s1 + $0x40] sm:$0xff] }
 0x1c1   : > { %5073 = vmatpush3.bf16.xpose.msk.msra.mxu0 %vm5522_vm2, %v5071_v41  ;;  %5112 = vmatprep.subr.bf16.mxu1 %v7159_v2  ;;  %v5142_v41 = vpack.c.bf16 %v2585_v31, %v2584_v24  ;;  %v2937_v24 = vld [vmem:[%s5518_s30 + $0x142] sm:$0xff] }
 0x1c2   : > { %5076 = vmatprep.subr.msk.bf16.mxu0 %vm5522_vm2, %v5074_v0  ;;  %v2600_v0 = vld [vmem:[%s5518_s30 + $0x161] sm:$0xff] }
 0x1c3   : > { %v2905_v31 = vld [vmem:[%s5518_s30 + $0x42] sm:$0xff] }
 0x1c8   : > { %5115 = vmatpush3.bf16.xpose.msk.msra.mxu1 %vm5522_vm2, %v5113_v14  ;;  %v2587_v14 = vld [vmem:[%s5518_s30 + $0xf9] sm:$0xff] }
 0x1c9   : > { %5079 = vmatpush3.bf16.xpose.msk.msra.mxu0 %vm5522_vm2, %v5077_v20  ;;  %5116 = vmatprep.subr.bf16.mxu1 %v7159_v2  ;;  %v5185_v20 = vpack.c.bf16 %v2601_v40, %v2600_v0  ;;  %v5148_v19 = vpack.c.bf16 %v2587_v14, %v2586_v55  ;;  %v2907_v55 = vld [vmem:[%s5518_s30 + $0x52] sm:$0xff]  ;;  %v2908_v14 = vld [vmem:[%s5518_s30 + $0x5a] sm:$0xff] }
 0x1ca   : > { %5082 = vmatprep.subr.msk.bf16.mxu0 %vm5522_vm2, %v5080_v17  ;;  %v5145_v17 = vpack.c.bf16 %v2569_v12, %v2568_v50  ;;  %v2939_v12 = vld [vmem:[%s5518_s30 + $0x152] sm:$0xff] }
 0x1d0   : > { %5119 = vmatpush3.bf16.xpose.msk.msra.mxu1 %vm5522_vm2, %v5117_v27  ;;  %v2588_v27 = vld [vmem:[%s5518_s30 + $0x101] sm:$0xff] }
 0x1d1   : > { %5085 = vmatpush3.bf16.xpose.msk.msra.mxu0 %vm5522_vm2, %v5083_v26  ;;  %5120 = vmatprep.subr.bf16.mxu1 %v7159_v2  ;;  %v2589_v26 = vld [vmem:[%s5518_s30 + $0x109] sm:$0xff] }
 0x1d2   : > { %5088 = vmatprep.subr.msk.bf16.mxu0 %vm5522_vm2, %v5086_v28  ;;  %v5189_v28 = vpack.c.bf16 %v2603_v46, %v2602_v43  ;;  %v5154_v30 = vpack.c.bf16 %v2589_v26, %v2588_v27  ;;  %v5219_v43 = vpack.c.bf16 %v2908_v14, %v2907_v55  ;;  %v2909_v27 = vld [vmem:[%s5518_s30 + $0x62] sm:$0xff]  ;;  %v2910_v26 = vld [vmem:[%s5518_s30 + $0x6a] sm:$0xff] }
 0x1d8   : > { %5123 = vmatpush3.bf16.xpose.msk.msra.mxu1 %vm5522_vm2, %v5121_v37  ;;  %v5193_v37 = vpack.c.bf16 %v6517_v61, %v6501_v48  ;;  %v2574_v48 = vld [vmem:[%s5518_s30 + $0x91] sm:$0xff]  ;;  %v2575_v61 = vld [vmem:[%s5518_s30 + $0x99] sm:$0xff] }
 0x1d9   : > { %5091 = vmatpush3.bf16.xpose.msk.msra.mxu0 %vm5522_vm2, %v5089_v38  ;;  %5172 = vmatprep.subr.bf16.mxu1 %v7159_v2  ;;  %v5157_v38 = vpack.c.bf16 %v2573_v35, %v2572_v47  ;;  %v5163_v8 = vpack.c.bf16 %v2575_v61, %v2574_v48  ;;  %v5225_v47 = vpack.c.bf16 %v2910_v26, %v2909_v27 }
 0x1da   : > { %5126 = vmatprep.subr.msk.bf16.mxu0 %vm5522_vm2, %v5124_v39  ;;  %v5160_v39 = vpack.c.bf16 %v2591_v36, %v2590_v51  ;;  %v2943_v51 = vld [vmem:[%s5518_s30 + $0x172] sm:$0xff]  ;;  %v2944_v36 = vld [vmem:[%s5518_s30 + $0x17a] sm:$0xff] }
 0x1db   : > { %v5269_v48 = vpack.c.bf16 %v2944_v36, %v2943_v51 }
 0x1df   : > { %4492 = vmatmul.mubr.msk.f32.vlgmr.msra.gmra.mrb[0].mxu1 %vm224_vm0, %v6674_v34 }
 0x1e0   : > { %4129 = vmatmul.mubr.msk.f32.vlgmr.msra.gmra.mrb[0].mxu0 %vm224_vm0, %v6674_v34  ;;  %5175 = vmatpush3.bf16.xpose.msk.msra.mxu1 %vm5522_vm2, %v5173_v52  ;;  %v2564_v34 = vld [vmem:[%s5518_s30 + $0x41] sm:$0xff] }
 0x1e1   : > { %5129 = vmatpush3.bf16.xpose.msk.msra.mxu0 %vm5522_vm2, %v5127_v5  ;;  %5176 = vmatprep.subr.bf16.mxu1 %v7159_v2  ;;  %v5133_v18 = vpack.c.bf16 %v2565_v56, %v2564_v34  ;;  %v2608_v52 = vld [vmem:[%s5518_s30 + $0x1a1] sm:$0xff]  ;;  %v2609_v5 = vld [vmem:[%s5518_s30 + $0x1a9] sm:$0xff] }
 0x1e2   : > { %5132 = vmatprep.subr.msk.bf16.mxu0 %vm5522_vm2, %v5130_v13  ;;  %4526 = vmatprep.mubr.msk.f32.mxu1 %vm5431_vm1, %v7204_v42  ;;  %v2577_v13 = vld [vmem:[%s5518_s30 + $0xa9] sm:$0xff]  ;;  %v5201_v34 = vpack.c.bf16 %v2609_v5, %v2608_v52  ;;  %v5273_v52 = vpack.c.bf16 %v6643_v32, %v6627_v60  ;;  %v2916_v60 = vld [vmem:[%s5518_s30 + $0x9a] sm:$0xff] }
 0x1e3   : > { %4179 = vmatprep.mubr.msk.f32.mxu0 %vm224_vm0, %v6791_v53  ;;  %v5169_v56 = vpack.c.bf16 %v2577_v13, %v2576_v62  ;;  %v2948_v13 = vld [vmem:[%s5518_s30 + $0x19a] sm:$0xff]  ;;  %v2933_v32 = vld [vmem:[%s5518_s30 + $0x122] sm:$0xff] }
 0x1e8   : > { %5179 = vmatpush3.bf16.xpose.msk.msra.mxu1 %vm5522_vm2, %v5177_v10  ;;  %v2904_v10 = vld [vmem:[%s5518_s30 + $0x3a] sm:$0xff] }
 0x1e9   : > { %5135 = vmatpush3.bf16.xpose.msk.msra.mxu0 %vm5522_vm2, %v5133_v18  ;;  %5180 = vmatprep.subr.bf16.mxu1 %v7159_v2  ;;  %v2921_v18 = vld [vmem:[%s5518_s30 + $0xc2] sm:$0xff]  ;;  %v5207_v22 = vpack.c.bf16 %v2904_v10, %v2903_v9  ;;  %v2918_v10 = vld [vmem:[%s5518_s30 + $0xaa] sm:$0xff] }
 0x1ea   : > { %5138 = vmatprep.subr.msk.bf16.mxu0 %vm5522_vm2, %v5136_v15  ;;  %v2922_v15 = vld [vmem:[%s5518_s30 + $0xca] sm:$0xff]  ;;  %v2917_v9 = vld [vmem:[%s5518_s30 + $0xa2] sm:$0xff] }
 0x1eb   : > { %v5210_v23 = vpack.c.bf16 %v2922_v15, %v2921_v18  ;;  %v5249_v18 = vpack.c.bf16 %v2918_v10, %v2917_v9 }
 0x1f0   : > { %5183 = vmatpush3.bf16.xpose.msk.msra.mxu1 %vm5522_vm2, %v5181_v59  ;;  %v2906_v59 = vld [vmem:[%s5518_s30 + $0x4a] sm:$0xff] }
 0x1f1   : > { %5141 = vmatpush3.bf16.xpose.msk.msra.mxu0 %vm5522_vm2, %v5139_v33  ;;  %5184 = vmatprep.subr.bf16.mxu1 %v7159_v2  ;;  %v2923_v33 = vld [vmem:[%s5518_s30 + $0xd2] sm:$0xff]  ;;  %v5213_v40 = vpack.c.bf16 %v2906_v59, %v2905_v31 }
 0x1f2   : > { %5144 = vmatprep.subr.msk.bf16.mxu0 %vm5522_vm2, %v5142_v41  ;;  %v2924_v41 = vld [vmem:[%s5518_s30 + $0xda] sm:$0xff] }
 0x1f3   : > { %v5216_v50 = vpack.c.bf16 %v2924_v41, %v2923_v33 }
 0x1f8   : > { %5187 = vmatpush3.bf16.xpose.msk.msra.mxu1 %vm5522_vm2, %v5185_v20  ;;  %v2925_v20 = vld [vmem:[%s5518_s30 + $0xe2] sm:$0xff] }
 0x1f9   : > { %5147 = vmatpush3.bf16.xpose.msk.msra.mxu0 %vm5522_vm2, %v5145_v17  ;;  %5188 = vmatprep.subr.bf16.mxu1 %v7159_v2  ;;  %v2926_v17 = vld [vmem:[%s5518_s30 + $0xea] sm:$0xff] }
 0x1fa   : > { %5150 = vmatprep.subr.msk.bf16.mxu0 %vm5522_vm2, %v5148_v19  ;;  %v5222_v46 = vpack.c.bf16 %v2926_v17, %v2925_v20 }
 0x200   : > { %5191 = vmatpush3.bf16.xpose.msk.msra.mxu1 %vm5522_vm2, %v5189_v28  ;;  %v2927_v28 = vld [vmem:[%s5518_s30 + $0xf2] sm:$0xff] }
 0x201   : > { %5153 = vmatpush3.bf16.xpose.msk.msra.mxu0 %vm5522_vm2, %v5151_v29  ;;  %5192 = vmatprep.subr.bf16.mxu1 %v7159_v2  ;;  %v2928_v29 = vld [vmem:[%s5518_s30 + $0xfa] sm:$0xff] }
 0x202   : > { %5156 = vmatprep.subr.msk.bf16.mxu0 %vm5522_vm2, %v5154_v30  ;;  %v5265_v30 = vpack.c.bf16 %v2942_v21, %v2941_v25  ;;  %v5228_v35 = vpack.c.bf16 %v2928_v29, %v2927_v28 }
 0x208   : > { %5195 = vmatpush3.bf16.xpose.msk.msra.mxu1 %vm5522_vm2, %v5193_v37  ;;  %v2911_v37 = vld [vmem:[%s5518_s30 + $0x72] sm:$0xff] }
 0x209   : > { %5159 = vmatpush3.bf16.xpose.msk.msra.mxu0 %vm5522_vm2, %v5157_v38  ;;  %5196 = vmatprep.subr.bf16.mxu1 %v7159_v2  ;;  %v2912_v38 = vld [vmem:[%s5518_s30 + $0x7a] sm:$0xff] }
 0x20a   : > { %5162 = vmatprep.subr.msk.bf16.mxu0 %vm5522_vm2, %v5160_v39  ;;  %v2929_v39 = vld [vmem:[%s5518_s30 + $0x102] sm:$0xff]  ;;  %v5231_v61 = vpack.c.bf16 %v2912_v38, %v2911_v37 }
 0x20b   : > { %v5234_v45 = vpack.c.bf16 %v2930_v44, %v2929_v39 }
 0x210   : > { %5199 = vmatpush3.bf16.xpose.msk.msra.mxu1 %vm5522_vm2, %v5197_v4  ;;  %v2914_v4 = vld [vmem:[%s5518_s30 + $0x8a] sm:$0xff] }
 0x211   : > { %5165 = vmatpush3.bf16.xpose.msk.msra.mxu0 %vm5522_vm2, %v5163_v8  ;;  %5200 = vmatprep.subr.bf16.mxu1 %v7159_v2  ;;  %v2931_v8 = vld [vmem:[%s5518_s30 + $0x112] sm:$0xff]  ;;  %v5237_v5 = vpack.c.bf16 %v2914_v4, %v2913_v6 }
 0x212   : > { %5168 = vmatprep.subr.msk.bf16.mxu0 %vm5522_vm2, %v5166_v16  ;;  %v2932_v16 = vld [vmem:[%s5518_s30 + $0x11a] sm:$0xff] }
 0x213   : > { %v5240_v62 = vpack.c.bf16 %v2932_v16, %v2931_v8 }
 0x218   : > { %5203 = vmatpush3.bf16.xpose.msk.msra.mxu1 %vm5522_vm2, %v5201_v34  ;;  %v5277_v34 = vpack.c.bf16 %v2948_v13, %v6646_v49  ;;  %v5281_v49 = vpack.c.bf16 %v2950_v7, %v2949_v63 }
 0x219   : > { %5171 = vmatpush3.bf16.xpose.msk.msra.mxu0 %vm5522_vm2, %v5169_v56  ;;  %5252 = vmatprep.subr.bf16.mxu1 %v7159_v2  ;;  %v5243_v56 = vpack.c.bf16 %v2916_v60, %v2915_v54 }
 0x21a   : > { %5206 = vmatprep.subr.msk.bf16.mxu0 %vm5522_vm2, %v5204_v57  ;;  %v5246_v57 = vpack.c.bf16 %v2934_v1, %v2933_v32 }
 0x21f   : > { %4527 = vmatmul.mubr.msk.f32.vlgmr.msra.gmra.mrb[0].mxu1 %vm224_vm0, %v6791_v53 }
 0x220   : > { %4180 = vmatmul.mubr.msk.f32.vlgmr.msra.gmra.mrb[0].mxu0 %vm224_vm0, %v6791_v53  ;;  %5255 = vmatpush3.bf16.xpose.msk.msra.mxu1 %vm5522_vm2, %v5253_v11  ;;  %v2938_v53 = vld [vmem:[%s5518_s30 + $0x14a] sm:$0xff] }
 0x221   : > { %5209 = vmatpush3.bf16.xpose.msk.msra.mxu0 %vm5522_vm2, %v5207_v22  ;;  %5256 = vmatprep.subr.bf16.mxu1 %v7159_v2  ;;  %v5257_v0 = vpack.c.bf16 %v2938_v53, %v2937_v24 }
 0x222   : > { %5212 = vmatprep.subr.msk.bf16.mxu0 %vm5522_vm2, %v5210_v23  ;;  %4561 = vmatprep.mubr.msk.f32.mxu1 %vm5431_vm1, %v7204_v42  ;;  %v2940_v42 = vld [vmem:[%s5518_s30 + $0x15a] sm:$0xff]  ;;  %s5321_s30 = smul.u32 384, %s5476_s16  ;;  %s3251_s16 = scalar_lea.sflag [#allocation3], %s161_s5 }
 0x223   : > { %4230 = vmatprep.mubr.msk.f32.mxu0 %vm224_vm0, %v6911_v58  ;;  %v5261_v19 = vpack.c.bf16 %v2940_v42, %v2939_v12 }
 0x224   : > { %s7019_s11 = scalar_lea.hbm %s7064_s3, %s5321_s30 }
 0x228   : > { %5259 = vmatpush3.bf16.xpose.msk.msra.mxu1 %vm5522_vm2, %v5257_v0 }
 0x229   : > { %5215 = vmatpush3.bf16.xpose.msk.msra.mxu0 %vm5522_vm2, %v5213_v40  ;;  %5260 = vmatprep.subr.bf16.mxu1 %v7159_v2 }
 0x22a   : > { %5218 = vmatprep.subr.msk.bf16.mxu0 %vm5522_vm2, %v5216_v50 }
 0x230   : > { %5263 = vmatpush3.bf16.xpose.msk.msra.mxu1 %vm5522_vm2, %v5261_v19 }
 0x231   : > { %5221 = vmatpush3.bf16.xpose.msk.msra.mxu0 %vm5522_vm2, %v5219_v43  ;;  %5264 = vmatprep.subr.bf16.mxu1 %v7159_v2 }
 0x232   : > { %5224 = vmatprep.subr.msk.bf16.mxu0 %vm5522_vm2, %v5222_v46 }
 0x238   : > { %5267 = vmatpush3.bf16.xpose.msk.msra.mxu1 %vm5522_vm2, %v5265_v30 }
 0x239   : > { %5227 = vmatpush3.bf16.xpose.msk.msra.mxu0 %vm5522_vm2, %v5225_v47  ;;  %5268 = vmatprep.subr.bf16.mxu1 %v7159_v2 }
 0x23a   : > { %5230 = vmatprep.subr.msk.bf16.mxu0 %vm5522_vm2, %v5228_v35 }
 0x240   : > { %5271 = vmatpush3.bf16.xpose.msk.msra.mxu1 %vm5522_vm2, %v5269_v48 }
 0x241   : > { %5233 = vmatpush3.bf16.xpose.msk.msra.mxu0 %vm5522_vm2, %v5231_v61  ;;  %5272 = vmatprep.subr.bf16.mxu1 %v7159_v2 }
 0x242   : > { %5236 = vmatprep.subr.msk.bf16.mxu0 %vm5522_vm2, %v5234_v45 }
 0x248   : > { %5275 = vmatpush3.bf16.xpose.msk.msra.mxu1 %vm5522_vm2, %v5273_v52 }
 0x249   : > { %5239 = vmatpush3.bf16.xpose.msk.msra.mxu0 %vm5522_vm2, %v5237_v5  ;;  %5276 = vmatprep.subr.bf16.mxu1 %v7159_v2 }
 0x24a   : > { %5242 = vmatprep.subr.msk.bf16.mxu0 %vm5522_vm2, %v5240_v62 }
 0x250   : > { %5279 = vmatpush3.bf16.xpose.msk.msra.mxu1 %vm5522_vm2, %v5277_v34 }
 0x251   : > { %5245 = vmatpush3.bf16.xpose.msk.msra.mxu0 %vm5522_vm2, %v5243_v56  ;;  %5280 = vmatprep.subr.bf16.mxu1 %v7159_v2  ;;  %v173_v2 = vpop.permute.xlu0 %172 }
 0x252   : > { %5248 = vmatprep.subr.msk.bf16.mxu0 %vm5522_vm2, %v5246_v57 }
 0x258   : > { %5283 = vmatpush3.bf16.xpose.msk.msra.mxu1 %vm5522_vm2, %v5281_v49 }
 0x259   : > { %5251 = vmatpush3.bf16.xpose.msk.msra.mxu0 %vm5522_vm2, %v5249_v18 }
 0x25f   : > { %4562 = vmatmul.mubr.msk.f32.vlgmr.msra.gmra.mrb[0].mxu1 %vm224_vm0, %v6911_v58 }
 0x260   : > { %4231 = vmatmul.mubr.msk.f32.vlgmr.msra.gmra.mrb[0].mxu0 %vm224_vm0, %v6911_v58 }
 0x332   : > { %v3237_v15 = vpop.f32.mrb[0].mxu1 }
 0x333   : > { %v3166_v11 = vpop.f32.mrb[0].mxu0  ;;  %v5286_v22 = vadd.f32 %v3237_v15, %v173_v2  ;;  %v4563_v24 = vpop.f32.mrb[1].mxu1 }
 0x334   : > { %v5284_v23 = vadd.f32 %v3166_v11, %v173_v2  ;;  %v3168_v53 = vpop.f32.mrb[1].mxu0 }
 0x335   : > { %v5285_v3 = vadd.f32 %v3168_v53, %v173_v2  ;;  %v3246_v31 = vmax.f32 %v5286_v22, 0.0 }
 0x336   : > { %v3244_v59 = vmax.f32 %v5284_v23, 0.0 }
 0x337   : > { %v3245_v33 = vmax.f32 %v5285_v3, 0.0  ;;  %3249 = vst [vmem:[%s163_s7 + $0x10] sm:$0xff] %v3246_v31 }
 0x338   : > { %3247 = vst [vmem:[%s163_s7] sm:$0xff] %v3244_v59 }
 0x339   : > { %3248 = vst [vmem:[%s163_s7 + $0x8] sm:$0xff] %v3245_v33 }
 0x33a   : > { %5379 = shalt.err (!%p5376_p3)
}
 0x33b   : > { %s5380_s25 = scalar_lea.hbm %s7019_s11, 384  ;;  %s5384_s28 = scalar_lea.hbm %s7064_s3, 768 }
 0x33c   : > { %p5381_p4 = scmp.ne.s32.totalorder %s7019_s11, %s5380_s25  ;;  %p5385_p9 = scmp.lt.u32.totalorder %s7019_s11, %s7064_s3 }
 0x33d   : > { %p5386_p10 = scmp.lt.u32.totalorder %s5384_s28, %s5380_s25  ;;  %p5388_p12 = scmp.lt.u32.totalorder %s5380_s25, %s7019_s11 }
 0x33e   : > { %p5382_p7 = pnand %p5381_p4, %p5493_p5 }
 0x33f   : > { %p5387_p11 = por %p5386_p10, %p5385_p9 }
 0x340   : > { %p5383_p8 = pneg %p5382_p7 }
 0x341   : > { %p5389_p13 = por %p5388_p12, %p5387_p11 }
 0x343   : > { %p5390_p0 = pnand %p5389_p13, %p5383_p8 }
 0x345   : > { %5393 = shalt.err (!%p5390_p0)
}
 0x346   : > { %5322 = dma.vmem_to_hbm [thread:$0]  (%p5493_p5), %s7021_s8, 384, %s7019_s11, %s3251_s16  }
 0x347 PF: > { %p5328_p1 = scmp.ge.s32.totalorder %s5428_s15, 2  ;;  %s3277_s5 = sand.u32 1, %s5416_s12  }
 0x348   : > { %s3278_s6 = scalar_lea.sflag [#allocation3], %s3277_s5 }
 0x349   : > { %p5325_p2 = pnand %p5328_p1, %p5497_p6 }
 0x34b   : > { %5411 = dma.done.wait (!%p5325_p2), %s3278_s6, 384  }
 0x34c   : > { %5413 = vsyncadd (!%p5325_p2), %s3278_s6, 4294966912  ;;  %p13_p3 = scmp.ge.s32.totalorder %s5480_s18, 4   ;;  %s7317_s12 = smov %s5420_s13 }
 0x34d   : > { %s7318_s13 = smov %s5424_s14  ;;  %s7319_s14 = smov %s5491_s21 }
 0x34e   : > { %s7320_s15 = smov %s5480_s18  ;;  %15 = sbr.rel (!%p13_p3) target bundleno = 3 (0x3), region = 75 }
 0x355   :  { %3283 = vsyncpa [#allocation3], 1 }
 0x356   :  { %3285 = vsyncpa [#allocation3 + $0x1], 1 }

</bundles_post_ra>
